<compile_context>
chip_gen: v7x
topology: tpu7x:2x2x1
jax: 0.10.0
libtpu: 0.0.40
codegen_flags: <defaults>
</compile_context>

<pallas_src>
import functools
import math

import jax
import jax.numpy as jnp
from jax.experimental import pallas as pl
from jax.experimental.pallas import tpu as pltpu


def _layer_norm(x, gamma, beta, eps=1e-5):
    # f32 VPU math.
    mu = jnp.mean(x, axis=-1, keepdims=True)
    var = jnp.mean((x - mu) ** 2, axis=-1, keepdims=True)
    return (x - mu) * jax.lax.rsqrt(var + eps) * gamma + beta


def transformer_block_kernel(
    q_ref, k_ref, v_ref,
    wq_ref, bq_ref, wk_ref, bk_ref, wv_ref, bv_ref, wo_ref, bo_ref,
    ln1_g_ref, ln1_b_ref,
    w1_ref, b1_ref, w2_ref, b2_ref,
    ln2_g_ref, ln2_b_ref,
    out_ref,
    attn_stage_ref,
    *, n_heads, seq_len, ffn_chunk,
):
    rows, kdim = q_ref.shape           # rows = Bt * L
    vdim = v_ref.shape[-1]
    L = seq_len
    Bt = rows // L
    hdk = kdim // n_heads
    hdv = vdim // n_heads
    fdim = w1_ref.shape[-1]
    scale = 1.0 / math.sqrt(hdk)
    cdt = jnp.bfloat16                 # MXU input dtype; f32 accumulation everywhere.

    # --- input projections: one big MXU matmul each over the whole row slab ---
    Vr = v_ref[...]                    # f32, kept for the residual (the PyTorch
                                       # block adds V as the skip connection).
    q = jnp.dot(q_ref[...].astype(cdt), wq_ref[...],
                preferred_element_type=jnp.float32) + bq_ref[...]
    k = jnp.dot(k_ref[...].astype(cdt), wk_ref[...],
                preferred_element_type=jnp.float32) + bk_ref[...]
    v = jnp.dot(Vr.astype(cdt), wv_ref[...],
                preferred_element_type=jnp.float32) + bv_ref[...]

    q3 = q.reshape(Bt, L, kdim)        # f32 views for per-head slicing
    k3 = k.reshape(Bt, L, kdim)
    v3 = v.reshape(Bt, L, vdim)

    # --- multi-head attention; per-head outputs staged at lane offset h*hdv ---
    # TODO(synk): attn_mask support omitted (forward exercised with attn_mask=None).
    # TODO(synk): for large L, replace with flash-style KV tiling (online softmax)
    #             so the (Bt, L, L) f32 score buffers never materialize.
    for h in range(n_heads):
        qh = q3[:, :, h * hdk:(h + 1) * hdk].astype(cdt)      # (Bt, L, hdk)
        kh = k3[:, :, h * hdk:(h + 1) * hdk].astype(cdt)
        vh = v3[:, :, h * hdv:(h + 1) * hdv].astype(cdt)
        s = jnp.einsum("bqd,bkd->bqk", qh, kh,
                       preferred_element_type=jnp.float32) * scale
        s = s - jnp.max(s, axis=-1, keepdims=True)
        p = jnp.exp(s)
        # EUP approximate reciprocal instead of a VALU divide.
        p = p * pl.reciprocal(jnp.sum(p, axis=-1, keepdims=True), approx=True)
        o = jnp.einsum("bqk,bkd->bqd", p.astype(cdt), vh,
                       preferred_element_type=jnp.float32)    # (Bt, L, hdv)
        # Lane-sliced store into the bf16 staging buffer (the "concat").
        attn_stage_ref[:, h * hdv:(h + 1) * hdv] = (
            o.reshape(rows, hdv).astype(cdt))

    # Single output projection with full contraction K = vdim.
    attn_out = jnp.dot(attn_stage_ref[...], wo_ref[...],
                       preferred_element_type=jnp.float32) + bo_ref[...]

    # --- residual + LayerNorm (attention branch), f32 ---
    sub0 = _layer_norm(attn_out + Vr, ln1_g_ref[...], ln1_b_ref[...])

    # --- FFN: Linear -> ReLU -> Linear, chunked over the hidden dim ---
    # TODO(synk): for very large fdim, stream w1/w2 column/row chunks from HBM via
    #             pltpu.emit_pipeline instead of keeping them fully VMEM-resident.
    sub0_c = sub0.astype(cdt)
    b1 = b1_ref[...]
    ffn = jnp.zeros((rows, vdim), jnp.float32)
    for f0 in range(0, fdim, ffn_chunk):
        f1 = min(f0 + ffn_chunk, fdim)
        hid = jnp.dot(sub0_c, w1_ref[:, f0:f1],
                      preferred_element_type=jnp.float32) + b1[:, f0:f1]
        hid = jnp.maximum(hid, 0.0)
        ffn = ffn + jnp.dot(hid.astype(cdt), w2_ref[f0:f1, :],
                            preferred_element_type=jnp.float32)
    ffn = ffn + b2_ref[...]

    # --- residual + LayerNorm (FFN branch) ---
    sub1 = _layer_norm(ffn + sub0, ln2_g_ref[...], ln2_b_ref[...])

    out_ref[...] = sub1.astype(out_ref.dtype)                 # lane-dense 2-D store


def _pick_batch_block(B, L, target_rows=512, min_grid=2):
    """Smallest divisor Bt of B with Bt*L >= target_rows, while keeping at least
    `min_grid` grid steps (so both v7x TensorCores get work). Falls back to the
    largest divisor that still honors the grid constraint."""
    divs = [d for d in range(1, B + 1) if B % d == 0]
    grid_ok = [d for d in divs if B // d >= min_grid]
    pool = grid_ok if grid_ok else divs
    for d in pool:
        if d * L >= target_rows:
            return d
    return pool[-1]


def _vmem_limit_bytes():
    """Generation-aware VMEM budget: ~3/4 of physical VMEM (96 MiB on v5e/v6e's
    128 MiB, 48 MiB on v7x's 64 MiB), leaving headroom for internal scratch."""
    try:
        cap = pltpu.get_tpu_info().vmem_capacity_bytes
    except Exception:  # pragma: no cover - unknown chip / interpret mode
        cap = 64 * 1024 * 1024
    return min(int(cap) * 3 // 4, 100 * 1024 * 1024)


def transformer_block(Q, K, V, params, *, n_heads, batch_block=None,
                      ffn_chunk=2048):
    B, L, kdim = Q.shape
    vdim = V.shape[-1]
    fdim = params["w1"].shape[1]
    bt = batch_block if batch_block is not None else _pick_batch_block(B, L)
    assert B % bt == 0
    rows = bt * L
    ffn_chunk = max(1, min(ffn_chunk, fdim))

    # Ship matmul weights as bf16 (MXU-native; halves weight VMEM + HBM DMA).
    # Biases / LayerNorm params stay f32 (f32 VPU math).
    wdt = jnp.bfloat16
    wq, wk, wv, wo = (params[n].astype(wdt) for n in ("wq", "wk", "wv", "wo"))
    w1, w2 = params["w1"].astype(wdt), params["w2"].astype(wdt)

    # Present activations as 2-D (B*L, d) row slabs: lane-dense DMA/stores and no
    # in-kernel relayout of the pipelined blocks.  (For production shapes keep
    # L % 8 == 0 and kdim/vdim % 128 == 0 so the in-kernel (Bt,L,.) views are free.)
    Q2 = Q.reshape(B * L, kdim)
    K2 = K.reshape(B * L, kdim)
    V2 = V.reshape(B * L, vdim)

    row_spec = lambda d: pl.BlockSpec((rows, d), lambda b: (b, 0))
    # Constant across the grid -> never re-DMA'd; single-buffered to halve their
    # VMEM footprint (matters on v7x's 64 MiB VMEM).
    const = lambda shape: pl.BlockSpec(shape, lambda b: (0,) * len(shape),
                                       pipeline_mode=pl.Buffered(1))

    in_specs = [
        row_spec(kdim), row_spec(kdim), row_spec(vdim),        # Q, K, V
        const((kdim, kdim)), const((1, kdim)),                 # Wq, bq
        const((kdim, kdim)), const((1, kdim)),                 # Wk, bk
        const((vdim, vdim)), const((1, vdim)),                 # Wv, bv
        const((vdim, vdim)), const((1, vdim)),                 # Wo, bo
        const((1, vdim)), const((1, vdim)),                    # ln1 gamma, beta
        const((vdim, fdim)), const((1, fdim)),                 # W1, b1
        const((fdim, vdim)), const((1, vdim)),                 # W2, b2
        const((1, vdim)), const((1, vdim)),                    # ln2 gamma, beta
    ]

    kernel = functools.partial(transformer_block_kernel, n_heads=n_heads,
                               seq_len=L, ffn_chunk=ffn_chunk)

    # Advisory cost estimate for XLA's scheduler.
    flops = int(2 * B * L * (2 * kdim * kdim + 2 * vdim * vdim + 2 * vdim * fdim)
                + 2 * B * L * L * (kdim + vdim))
    transcendentals = int(B * n_heads * L * L + 4 * B * L)
    bytes_accessed = int(
        4 * (Q.size + K.size + V.size + B * L * vdim)
        + 2 * (wq.size + wk.size + wv.size + wo.size + w1.size + w2.size)
        + 4 * (6 * vdim + 2 * kdim + fdim))

    out2 = pl.pallas_call(
        kernel,
        out_shape=jax.ShapeDtypeStruct((B * L, vdim), V.dtype),
        grid_spec=pltpu.PrefetchScalarGridSpec(
            num_scalar_prefetch=0,
            grid=(B // bt,),
            in_specs=in_specs,
            out_specs=row_spec(vdim),
            scratch_shapes=[pltpu.VMEM((rows, vdim), jnp.bfloat16)],
        ),
        compiler_params=pltpu.CompilerParams(
            dimension_semantics=("parallel",),
            vmem_limit_bytes=_vmem_limit_bytes(),
        ),
        cost_estimate=pl.CostEstimate(
            flops=flops,
            transcendentals=transcendentals,
            bytes_accessed=bytes_accessed,
        ),
    )(
        Q2, K2, V2,
        wq, params["bq"], wk, params["bk"],
        wv, params["bv"], wo, params["bo"],
        params["ln1_g"], params["ln1_b"],
        w1, params["b1"], w2, params["b2"],
        params["ln2_g"], params["ln2_b"],
    )
    return out2.reshape(B, L, vdim)


def init_params(key, kdim, vdim, n_heads, forward_expansion):
    fdim = forward_expansion * vdim
    keys = jax.random.split(key, 12)

    def lin(k, in_d, out_d):
        # weight stored pre-transposed: (in_d, out_d)
        return jax.random.normal(k, (in_d, out_d), jnp.float32) * 0.05

    return {
        "wq": lin(keys[0], kdim, kdim), "bq": jnp.zeros((1, kdim), jnp.float32),
        "wk": lin(keys[1], kdim, kdim), "bk": jnp.zeros((1, kdim), jnp.float32),
        "wv": lin(keys[2], vdim, vdim), "bv": jnp.zeros((1, vdim), jnp.float32),
        "wo": lin(keys[3], vdim, vdim), "bo": jnp.zeros((1, vdim), jnp.float32),
        "ln1_g": jnp.ones((1, vdim), jnp.float32),
        "ln1_b": jnp.zeros((1, vdim), jnp.float32),
        "w1": lin(keys[4], vdim, fdim),
        "b1": jax.random.normal(keys[5], (1, fdim), jnp.float32) * 0.01,
        "w2": lin(keys[6], fdim, vdim),
        "b2": jax.random.normal(keys[7], (1, vdim), jnp.float32) * 0.01,
        "ln2_g": jnp.ones((1, vdim), jnp.float32),
        "ln2_b": jnp.zeros((1, vdim), jnp.float32),
    }


def reference(Q, K, V, p, n_heads):
    # Pure-JAX f32 reference with identical semantics (sanity check).
    def ln(x, g, b, eps=1e-5):
        mu = x.mean(-1, keepdims=True)
        var = ((x - mu) ** 2).mean(-1, keepdims=True)
        return (x - mu) / jnp.sqrt(var + eps) * g + b

    B, L, kdim = Q.shape
    vdim = V.shape[-1]
    hdk, hdv = kdim // n_heads, vdim // n_heads
    q = Q @ p["wq"] + p["bq"]
    k = K @ p["wk"] + p["bk"]
    v = V @ p["wv"] + p["bv"]
    qh = q.reshape(B, L, n_heads, hdk).transpose(0, 2, 1, 3)
    kh = k.reshape(B, L, n_heads, hdk).transpose(0, 2, 1, 3)
    vh = v.reshape(B, L, n_heads, hdv).transpose(0, 2, 1, 3)
    s = jnp.einsum("bhqd,bhkd->bhqk", qh, kh) / jnp.sqrt(jnp.float32(hdk))
    pr = jax.nn.softmax(s, axis=-1)
    o = jnp.einsum("bhqk,bhkd->bhqd", pr, vh).transpose(0, 2, 1, 3).reshape(B, L, vdim)
    attn = o @ p["wo"] + p["bo"]
    sub0 = ln(attn + V, p["ln1_g"], p["ln1_b"])
    f = jnp.maximum(sub0 @ p["w1"] + p["b1"], 0.0) @ p["w2"] + p["b2"]
    return ln(f + sub0, p["ln2_g"], p["ln2_b"])


if __name__ == "__main__":
    B, L = 2, 8
    kdim, vdim = 32, 32
    n_heads, forward_expansion = 4, 2

    key = jax.random.PRNGKey(0)
    kq, kk, kv, kp = jax.random.split(key, 4)
    Q = jax.random.normal(kq, (B, L, kdim), jnp.float32)
    K = jax.random.normal(kk, (B, L, kdim), jnp.float32)
    V = jax.random.normal(kv, (B, L, vdim), jnp.float32)
    params = init_params(kp, kdim, vdim, n_heads, forward_expansion)

    out = transformer_block(Q, K, V, params, n_heads=n_heads)
    out = jax.block_until_ready(out)

    ref = reference(Q, K, V, params, n_heads)
    assert out.shape == (B, L, vdim)
    # bf16 MXU inputs (f32 accumulation) vs. a pure-f32 reference -> loosened tolerance.
    assert jnp.allclose(out, ref, atol=5e-2, rtol=5e-2), "mismatch vs reference"

    print("KERNEL_OK")
</pallas_src>

<mosaic_0001>
module attributes {stable_mosaic.version = 11 : i64} {
  func.func @transformer_block_kernel(%arg0: i32, %arg1: memref<8x32xf32, #tpu.memory_space<vmem>>, %arg2: memref<8x32xf32, #tpu.memory_space<vmem>>, %arg3: memref<8x32xf32, #tpu.memory_space<vmem>>, %arg4: memref<32x32xbf16, #tpu.memory_space<vmem>>, %arg5: memref<1x32xf32, #tpu.memory_space<vmem>>, %arg6: memref<32x32xbf16, #tpu.memory_space<vmem>>, %arg7: memref<1x32xf32, #tpu.memory_space<vmem>>, %arg8: memref<32x32xbf16, #tpu.memory_space<vmem>>, %arg9: memref<1x32xf32, #tpu.memory_space<vmem>>, %arg10: memref<32x32xbf16, #tpu.memory_space<vmem>>, %arg11: memref<1x32xf32, #tpu.memory_space<vmem>>, %arg12: memref<1x32xf32, #tpu.memory_space<vmem>>, %arg13: memref<1x32xf32, #tpu.memory_space<vmem>>, %arg14: memref<32x64xbf16, #tpu.memory_space<vmem>>, %arg15: memref<1x64xf32, #tpu.memory_space<vmem>>, %arg16: memref<64x32xbf16, #tpu.memory_space<vmem>>, %arg17: memref<1x32xf32, #tpu.memory_space<vmem>>, %arg18: memref<1x32xf32, #tpu.memory_space<vmem>>, %arg19: memref<1x32xf32, #tpu.memory_space<vmem>>, %arg20: memref<8x32xf32, #tpu.memory_space<vmem>>, %arg21: memref<8x32xbf16, #tpu.memory_space<vmem>>) attributes {dimension_semantics = [#tpu.dimension_semantics<parallel>], iteration_bounds = array<i64: 2>, scalar_prefetch = 0 : i64, scratch_operands = 1 : i64, tpu.core_type = #tpu.core_type<tc>, window_params = [{transform_indices = @transform_0, window_bounds = array<i64: 8, 32>}, {transform_indices = @transform_1, window_bounds = array<i64: 8, 32>}, {transform_indices = @transform_2, window_bounds = array<i64: 8, 32>}, {pipeline_mode = #tpu.pipeline_mode<synchronous>, transform_indices = @transform_3, window_bounds = array<i64: 32, 32>}, {pipeline_mode = #tpu.pipeline_mode<synchronous>, transform_indices = @transform_4, window_bounds = array<i64: 1, 32>}, {pipeline_mode = #tpu.pipeline_mode<synchronous>, transform_indices = @transform_5, window_bounds = array<i64: 32, 32>}, {pipeline_mode = #tpu.pipeline_mode<synchronous>, transform_indices = @transform_6, window_bounds = array<i64: 1, 32>}, {pipeline_mode = #tpu.pipeline_mode<synchronous>, transform_indices = @transform_7, window_bounds = array<i64: 32, 32>}, {pipeline_mode = #tpu.pipeline_mode<synchronous>, transform_indices = @transform_8, window_bounds = array<i64: 1, 32>}, {pipeline_mode = #tpu.pipeline_mode<synchronous>, transform_indices = @transform_9, window_bounds = array<i64: 32, 32>}, {pipeline_mode = #tpu.pipeline_mode<synchronous>, transform_indices = @transform_10, window_bounds = array<i64: 1, 32>}, {pipeline_mode = #tpu.pipeline_mode<synchronous>, transform_indices = @transform_11, window_bounds = array<i64: 1, 32>}, {pipeline_mode = #tpu.pipeline_mode<synchronous>, transform_indices = @transform_12, window_bounds = array<i64: 1, 32>}, {pipeline_mode = #tpu.pipeline_mode<synchronous>, transform_indices = @transform_13, window_bounds = array<i64: 32, 64>}, {pipeline_mode = #tpu.pipeline_mode<synchronous>, transform_indices = @transform_14, window_bounds = array<i64: 1, 64>}, {pipeline_mode = #tpu.pipeline_mode<synchronous>, transform_indices = @transform_15, window_bounds = array<i64: 64, 32>}, {pipeline_mode = #tpu.pipeline_mode<synchronous>, transform_indices = @transform_16, window_bounds = array<i64: 1, 32>}, {pipeline_mode = #tpu.pipeline_mode<synchronous>, transform_indices = @transform_17, window_bounds = array<i64: 1, 32>}, {pipeline_mode = #tpu.pipeline_mode<synchronous>, transform_indices = @transform_18, window_bounds = array<i64: 1, 32>}, {transform_indices = @transform_19, window_bounds = array<i64: 8, 32>}]} {
    %c0 = arith.constant 0 : index
    %c0_0 = arith.constant 0 : index
    %0 = vector.load %arg3[%c0, %c0_0] : memref<8x32xf32, #tpu.memory_space<vmem>>, vector<8x32xf32>
    %c0_1 = arith.constant 0 : index
    %c0_2 = arith.constant 0 : index
    %1 = vector.load %arg1[%c0_1, %c0_2] : memref<8x32xf32, #tpu.memory_space<vmem>>, vector<8x32xf32>
    %2 = arith.truncf %1 : vector<8x32xf32> to vector<8x32xbf16>
    %c0_3 = arith.constant 0 : index
    %c0_4 = arith.constant 0 : index
    %3 = vector.load %arg4[%c0_3, %c0_4] : memref<32x32xbf16, #tpu.memory_space<vmem>>, vector<32x32xbf16>
    %cst = arith.constant dense<0.000000e+00> : vector<8x32xf32>
    %4 = tpu.matmul %2, %3, %cst {dimension_numbers = #tpu.dot_dimension_numbers<[1], [0], [0], [1], [0, 0, 1, 1], [], []>} : vector<8x32xbf16>, vector<32x32xbf16>, vector<8x32xf32> -> vector<8x32xf32>
    %c0_5 = arith.constant 0 : index
    %c0_6 = arith.constant 0 : index
    %5 = vector.load %arg5[%c0_5, %c0_6] : memref<1x32xf32, #tpu.memory_space<vmem>>, vector<1x32xf32>
    %6 = vector.broadcast %5 : vector<1x32xf32> to vector<8x32xf32>
    %7 = arith.addf %4, %6 : vector<8x32xf32>
    %c0_7 = arith.constant 0 : index
    %c0_8 = arith.constant 0 : index
    %8 = vector.load %arg2[%c0_7, %c0_8] : memref<8x32xf32, #tpu.memory_space<vmem>>, vector<8x32xf32>
    %9 = arith.truncf %8 : vector<8x32xf32> to vector<8x32xbf16>
    %c0_9 = arith.constant 0 : index
    %c0_10 = arith.constant 0 : index
    %10 = vector.load %arg6[%c0_9, %c0_10] : memref<32x32xbf16, #tpu.memory_space<vmem>>, vector<32x32xbf16>
    %cst_11 = arith.constant dense<0.000000e+00> : vector<8x32xf32>
    %11 = tpu.matmul %9, %10, %cst_11 {dimension_numbers = #tpu.dot_dimension_numbers<[1], [0], [0], [1], [0, 0, 1, 1], [], []>} : vector<8x32xbf16>, vector<32x32xbf16>, vector<8x32xf32> -> vector<8x32xf32>
    %c0_12 = arith.constant 0 : index
    %c0_13 = arith.constant 0 : index
    %12 = vector.load %arg7[%c0_12, %c0_13] : memref<1x32xf32, #tpu.memory_space<vmem>>, vector<1x32xf32>
    %13 = vector.broadcast %12 : vector<1x32xf32> to vector<8x32xf32>
    %14 = arith.addf %11, %13 : vector<8x32xf32>
    %15 = arith.truncf %0 : vector<8x32xf32> to vector<8x32xbf16>
    %c0_14 = arith.constant 0 : index
    %c0_15 = arith.constant 0 : index
    %16 = vector.load %arg8[%c0_14, %c0_15] : memref<32x32xbf16, #tpu.memory_space<vmem>>, vector<32x32xbf16>
    %cst_16 = arith.constant dense<0.000000e+00> : vector<8x32xf32>
    %17 = tpu.matmul %15, %16, %cst_16 {dimension_numbers = #tpu.dot_dimension_numbers<[1], [0], [0], [1], [0, 0, 1, 1], [], []>} : vector<8x32xbf16>, vector<32x32xbf16>, vector<8x32xf32> -> vector<8x32xf32>
    %c0_17 = arith.constant 0 : index
    %c0_18 = arith.constant 0 : index
    %18 = vector.load %arg9[%c0_17, %c0_18] : memref<1x32xf32, #tpu.memory_space<vmem>>, vector<1x32xf32>
    %19 = vector.broadcast %18 : vector<1x32xf32> to vector<8x32xf32>
    %20 = arith.addf %17, %19 : vector<8x32xf32>
    %21 = vector.shape_cast %7 : vector<8x32xf32> to vector<1x8x32xf32>
    %22 = vector.shape_cast %14 : vector<8x32xf32> to vector<1x8x32xf32>
    %23 = vector.shape_cast %20 : vector<8x32xf32> to vector<1x8x32xf32>
    %24 = vector.extract_strided_slice %21 {offsets = [0, 0, 0], sizes = [1, 8, 8], strides = [1, 1, 1]} : vector<1x8x32xf32> to vector<1x8x8xf32>
    %25 = arith.truncf %24 : vector<1x8x8xf32> to vector<1x8x8xbf16>
    %26 = vector.extract_strided_slice %22 {offsets = [0, 0, 0], sizes = [1, 8, 8], strides = [1, 1, 1]} : vector<1x8x32xf32> to vector<1x8x8xf32>
    %27 = arith.truncf %26 : vector<1x8x8xf32> to vector<1x8x8xbf16>
    %28 = vector.extract_strided_slice %23 {offsets = [0, 0, 0], sizes = [1, 8, 8], strides = [1, 1, 1]} : vector<1x8x32xf32> to vector<1x8x8xf32>
    %29 = arith.truncf %28 : vector<1x8x8xf32> to vector<1x8x8xbf16>
    "tpu.trace_start"() <{level = 10 : i32, message = "bqd,bkd->bqk"}> : () -> ()
    %cst_19 = arith.constant dense<0.000000e+00> : vector<1x8x8xf32>
    %30 = tpu.matmul %25, %27, %cst_19 {dimension_numbers = #tpu.dot_dimension_numbers<[2], [2], [1], [1], [0, 0, 0, 1, 1, 1], [0], [0]>} : vector<1x8x8xbf16>, vector<1x8x8xbf16>, vector<1x8x8xf32> -> vector<1x8x8xf32>
    "tpu.trace_stop"() : () -> ()
    %cst_20 = arith.constant 0.353553385 : f32
    %31 = vector.broadcast %cst_20 : f32 to vector<1x8x8xf32>
    %32 = arith.mulf %30, %31 : vector<1x8x8xf32>
    %cst_21 = arith.constant dense<0xFF800000> : vector<1x8xf32>
    %33 = vector.multi_reduction <maximumf>, %32, %cst_21 [2] : vector<1x8x8xf32> to vector<1x8xf32>
    %34 = vector.shape_cast %33 : vector<1x8xf32> to vector<1x8x1xf32>
    %35 = vector.broadcast %34 : vector<1x8x1xf32> to vector<1x8x8xf32>
    %36 = arith.subf %32, %35 : vector<1x8x8xf32>
    %37 = math.exp %36 : vector<1x8x8xf32>
    %cst_22 = arith.constant dense<0.000000e+00> : vector<1x8xf32>
    %38 = vector.multi_reduction <add>, %37, %cst_22 [2] : vector<1x8x8xf32> to vector<1x8xf32>
    %39 = vector.shape_cast %38 : vector<1x8xf32> to vector<1x8x1xf32>
    %40 = tpu.reciprocal %39 {approx = true} : vector<1x8x1xf32> -> vector<1x8x1xf32>
    %41 = vector.broadcast %40 : vector<1x8x1xf32> to vector<1x8x8xf32>
    %42 = arith.mulf %37, %41 : vector<1x8x8xf32>
    %43 = arith.truncf %42 : vector<1x8x8xf32> to vector<1x8x8xbf16>
    "tpu.trace_start"() <{level = 10 : i32, message = "bqk,bkd->bqd"}> : () -> ()
    %cst_23 = arith.constant dense<0.000000e+00> : vector<1x8x8xf32>
    %44 = tpu.matmul %43, %29, %cst_23 {dimension_numbers = #tpu.dot_dimension_numbers<[2], [1], [1], [2], [0, 0, 0, 1, 1, 2], [0], [0]>} : vector<1x8x8xbf16>, vector<1x8x8xbf16>, vector<1x8x8xf32> -> vector<1x8x8xf32>
    "tpu.trace_stop"() : () -> ()
    %45 = vector.shape_cast %44 : vector<1x8x8xf32> to vector<8x8xf32>
    %46 = arith.truncf %45 : vector<8x8xf32> to vector<8x8xbf16>
    %c0_24 = arith.constant 0 : index
    %c0_25 = arith.constant 0 : index
    %47 = vector.load %arg21[%c0_24, %c0_25] : memref<8x32xbf16, #tpu.memory_space<vmem>>, vector<8x8xbf16>
    tpu.vector_store %arg21[%c0_24, %c0_25], %46 {strides = array<i32>} : memref<8x32xbf16, #tpu.memory_space<vmem>>, vector<8x8xbf16>,
    %48 = vector.extract_strided_slice %21 {offsets = [0, 0, 8], sizes = [1, 8, 8], strides = [1, 1, 1]} : vector<1x8x32xf32> to vector<1x8x8xf32>
    %49 = arith.truncf %48 : vector<1x8x8xf32> to vector<1x8x8xbf16>
    %50 = vector.extract_strided_slice %22 {offsets = [0, 0, 8], sizes = [1, 8, 8], strides = [1, 1, 1]} : vector<1x8x32xf32> to vector<1x8x8xf32>
    %51 = arith.truncf %50 : vector<1x8x8xf32> to vector<1x8x8xbf16>
    %52 = vector.extract_strided_slice %23 {offsets = [0, 0, 8], sizes = [1, 8, 8], strides = [1, 1, 1]} : vector<1x8x32xf32> to vector<1x8x8xf32>
    %53 = arith.truncf %52 : vector<1x8x8xf32> to vector<1x8x8xbf16>
    "tpu.trace_start"() <{level = 10 : i32, message = "bqd,bkd->bqk"}> : () -> ()
    %cst_26 = arith.constant dense<0.000000e+00> : vector<1x8x8xf32>
    %54 = tpu.matmul %49, %51, %cst_26 {dimension_numbers = #tpu.dot_dimension_numbers<[2], [2], [1], [1], [0, 0, 0, 1, 1, 1], [0], [0]>} : vector<1x8x8xbf16>, vector<1x8x8xbf16>, vector<1x8x8xf32> -> vector<1x8x8xf32>
    "tpu.trace_stop"() : () -> ()
    %cst_27 = arith.constant 0.353553385 : f32
    %55 = vector.broadcast %cst_27 : f32 to vector<1x8x8xf32>
    %56 = arith.mulf %54, %55 : vector<1x8x8xf32>
    %cst_28 = arith.constant dense<0xFF800000> : vector<1x8xf32>
    %57 = vector.multi_reduction <maximumf>, %56, %cst_28 [2] : vector<1x8x8xf32> to vector<1x8xf32>
    %58 = vector.shape_cast %57 : vector<1x8xf32> to vector<1x8x1xf32>
    %59 = vector.broadcast %58 : vector<1x8x1xf32> to vector<1x8x8xf32>
    %60 = arith.subf %56, %59 : vector<1x8x8xf32>
    %61 = math.exp %60 : vector<1x8x8xf32>
    %cst_29 = arith.constant dense<0.000000e+00> : vector<1x8xf32>
    %62 = vector.multi_reduction <add>, %61, %cst_29 [2] : vector<1x8x8xf32> to vector<1x8xf32>
    %63 = vector.shape_cast %62 : vector<1x8xf32> to vector<1x8x1xf32>
    %64 = tpu.reciprocal %63 {approx = true} : vector<1x8x1xf32> -> vector<1x8x1xf32>
    %65 = vector.broadcast %64 : vector<1x8x1xf32> to vector<1x8x8xf32>
    %66 = arith.mulf %61, %65 : vector<1x8x8xf32>
    %67 = arith.truncf %66 : vector<1x8x8xf32> to vector<1x8x8xbf16>
    "tpu.trace_start"() <{level = 10 : i32, message = "bqk,bkd->bqd"}> : () -> ()
    %cst_30 = arith.constant dense<0.000000e+00> : vector<1x8x8xf32>
    %68 = tpu.matmul %67, %53, %cst_30 {dimension_numbers = #tpu.dot_dimension_numbers<[2], [1], [1], [2], [0, 0, 0, 1, 1, 2], [0], [0]>} : vector<1x8x8xbf16>, vector<1x8x8xbf16>, vector<1x8x8xf32> -> vector<1x8x8xf32>
    "tpu.trace_stop"() : () -> ()
    %69 = vector.shape_cast %68 : vector<1x8x8xf32> to vector<8x8xf32>
    %70 = arith.truncf %69 : vector<8x8xf32> to vector<8x8xbf16>
    %c0_31 = arith.constant 0 : index
    %c8 = arith.constant 8 : index
    %71 = vector.load %arg21[%c0_31, %c8] : memref<8x32xbf16, #tpu.memory_space<vmem>>, vector<8x8xbf16>
    tpu.vector_store %arg21[%c0_31, %c8], %70 {strides = array<i32>} : memref<8x32xbf16, #tpu.memory_space<vmem>>, vector<8x8xbf16>,
    %72 = vector.extract_strided_slice %21 {offsets = [0, 0, 16], sizes = [1, 8, 8], strides = [1, 1, 1]} : vector<1x8x32xf32> to vector<1x8x8xf32>
    %73 = arith.truncf %72 : vector<1x8x8xf32> to vector<1x8x8xbf16>
    %74 = vector.extract_strided_slice %22 {offsets = [0, 0, 16], sizes = [1, 8, 8], strides = [1, 1, 1]} : vector<1x8x32xf32> to vector<1x8x8xf32>
    %75 = arith.truncf %74 : vector<1x8x8xf32> to vector<1x8x8xbf16>
    %76 = vector.extract_strided_slice %23 {offsets = [0, 0, 16], sizes = [1, 8, 8], strides = [1, 1, 1]} : vector<1x8x32xf32> to vector<1x8x8xf32>
    %77 = arith.truncf %76 : vector<1x8x8xf32> to vector<1x8x8xbf16>
    "tpu.trace_start"() <{level = 10 : i32, message = "bqd,bkd->bqk"}> : () -> ()
    %cst_32 = arith.constant dense<0.000000e+00> : vector<1x8x8xf32>
    %78 = tpu.matmul %73, %75, %cst_32 {dimension_numbers = #tpu.dot_dimension_numbers<[2], [2], [1], [1], [0, 0, 0, 1, 1, 1], [0], [0]>} : vector<1x8x8xbf16>, vector<1x8x8xbf16>, vector<1x8x8xf32> -> vector<1x8x8xf32>
    "tpu.trace_stop"() : () -> ()
    %cst_33 = arith.constant 0.353553385 : f32
    %79 = vector.broadcast %cst_33 : f32 to vector<1x8x8xf32>
    %80 = arith.mulf %78, %79 : vector<1x8x8xf32>
    %cst_34 = arith.constant dense<0xFF800000> : vector<1x8xf32>
    %81 = vector.multi_reduction <maximumf>, %80, %cst_34 [2] : vector<1x8x8xf32> to vector<1x8xf32>
    %82 = vector.shape_cast %81 : vector<1x8xf32> to vector<1x8x1xf32>
    %83 = vector.broadcast %82 : vector<1x8x1xf32> to vector<1x8x8xf32>
    %84 = arith.subf %80, %83 : vector<1x8x8xf32>
    %85 = math.exp %84 : vector<1x8x8xf32>
    %cst_35 = arith.constant dense<0.000000e+00> : vector<1x8xf32>
    %86 = vector.multi_reduction <add>, %85, %cst_35 [2] : vector<1x8x8xf32> to vector<1x8xf32>
    %87 = vector.shape_cast %86 : vector<1x8xf32> to vector<1x8x1xf32>
    %88 = tpu.reciprocal %87 {approx = true} : vector<1x8x1xf32> -> vector<1x8x1xf32>
    %89 = vector.broadcast %88 : vector<1x8x1xf32> to vector<1x8x8xf32>
    %90 = arith.mulf %85, %89 : vector<1x8x8xf32>
    %91 = arith.truncf %90 : vector<1x8x8xf32> to vector<1x8x8xbf16>
    "tpu.trace_start"() <{level = 10 : i32, message = "bqk,bkd->bqd"}> : () -> ()
    %cst_36 = arith.constant dense<0.000000e+00> : vector<1x8x8xf32>
    %92 = tpu.matmul %91, %77, %cst_36 {dimension_numbers = #tpu.dot_dimension_numbers<[2], [1], [1], [2], [0, 0, 0, 1, 1, 2], [0], [0]>} : vector<1x8x8xbf16>, vector<1x8x8xbf16>, vector<1x8x8xf32> -> vector<1x8x8xf32>
    "tpu.trace_stop"() : () -> ()
    %93 = vector.shape_cast %92 : vector<1x8x8xf32> to vector<8x8xf32>
    %94 = arith.truncf %93 : vector<8x8xf32> to vector<8x8xbf16>
    %c0_37 = arith.constant 0 : index
    %c16 = arith.constant 16 : index
    %95 = vector.load %arg21[%c0_37, %c16] : memref<8x32xbf16, #tpu.memory_space<vmem>>, vector<8x8xbf16>
    tpu.vector_store %arg21[%c0_37, %c16], %94 {strides = array<i32>} : memref<8x32xbf16, #tpu.memory_space<vmem>>, vector<8x8xbf16>,
    %96 = vector.extract_strided_slice %21 {offsets = [0, 0, 24], sizes = [1, 8, 8], strides = [1, 1, 1]} : vector<1x8x32xf32> to vector<1x8x8xf32>
    %97 = arith.truncf %96 : vector<1x8x8xf32> to vector<1x8x8xbf16>
    %98 = vector.extract_strided_slice %22 {offsets = [0, 0, 24], sizes = [1, 8, 8], strides = [1, 1, 1]} : vector<1x8x32xf32> to vector<1x8x8xf32>
    %99 = arith.truncf %98 : vector<1x8x8xf32> to vector<1x8x8xbf16>
    %100 = vector.extract_strided_slice %23 {offsets = [0, 0, 24], sizes = [1, 8, 8], strides = [1, 1, 1]} : vector<1x8x32xf32> to vector<1x8x8xf32>
    %101 = arith.truncf %100 : vector<1x8x8xf32> to vector<1x8x8xbf16>
    "tpu.trace_start"() <{level = 10 : i32, message = "bqd,bkd->bqk"}> : () -> ()
    %cst_38 = arith.constant dense<0.000000e+00> : vector<1x8x8xf32>
    %102 = tpu.matmul %97, %99, %cst_38 {dimension_numbers = #tpu.dot_dimension_numbers<[2], [2], [1], [1], [0, 0, 0, 1, 1, 1], [0], [0]>} : vector<1x8x8xbf16>, vector<1x8x8xbf16>, vector<1x8x8xf32> -> vector<1x8x8xf32>
    "tpu.trace_stop"() : () -> ()
    %cst_39 = arith.constant 0.353553385 : f32
    %103 = vector.broadcast %cst_39 : f32 to vector<1x8x8xf32>
    %104 = arith.mulf %102, %103 : vector<1x8x8xf32>
    %cst_40 = arith.constant dense<0xFF800000> : vector<1x8xf32>
    %105 = vector.multi_reduction <maximumf>, %104, %cst_40 [2] : vector<1x8x8xf32> to vector<1x8xf32>
    %106 = vector.shape_cast %105 : vector<1x8xf32> to vector<1x8x1xf32>
    %107 = vector.broadcast %106 : vector<1x8x1xf32> to vector<1x8x8xf32>
    %108 = arith.subf %104, %107 : vector<1x8x8xf32>
    %109 = math.exp %108 : vector<1x8x8xf32>
    %cst_41 = arith.constant dense<0.000000e+00> : vector<1x8xf32>
    %110 = vector.multi_reduction <add>, %109, %cst_41 [2] : vector<1x8x8xf32> to vector<1x8xf32>
    %111 = vector.shape_cast %110 : vector<1x8xf32> to vector<1x8x1xf32>
    %112 = tpu.reciprocal %111 {approx = true} : vector<1x8x1xf32> -> vector<1x8x1xf32>
    %113 = vector.broadcast %112 : vector<1x8x1xf32> to vector<1x8x8xf32>
    %114 = arith.mulf %109, %113 : vector<1x8x8xf32>
    %115 = arith.truncf %114 : vector<1x8x8xf32> to vector<1x8x8xbf16>
    "tpu.trace_start"() <{level = 10 : i32, message = "bqk,bkd->bqd"}> : () -> ()
    %cst_42 = arith.constant dense<0.000000e+00> : vector<1x8x8xf32>
    %116 = tpu.matmul %115, %101, %cst_42 {dimension_numbers = #tpu.dot_dimension_numbers<[2], [1], [1], [2], [0, 0, 0, 1, 1, 2], [0], [0]>} : vector<1x8x8xbf16>, vector<1x8x8xbf16>, vector<1x8x8xf32> -> vector<1x8x8xf32>
    "tpu.trace_stop"() : () -> ()
    %117 = vector.shape_cast %116 : vector<1x8x8xf32> to vector<8x8xf32>
    %118 = arith.truncf %117 : vector<8x8xf32> to vector<8x8xbf16>
    %c0_43 = arith.constant 0 : index
    %c24 = arith.constant 24 : index
    %119 = vector.load %arg21[%c0_43, %c24] : memref<8x32xbf16, #tpu.memory_space<vmem>>, vector<8x8xbf16>
    tpu.vector_store %arg21[%c0_43, %c24], %118 {strides = array<i32>} : memref<8x32xbf16, #tpu.memory_space<vmem>>, vector<8x8xbf16>,
    %c0_44 = arith.constant 0 : index
    %c0_45 = arith.constant 0 : index
    %120 = vector.load %arg21[%c0_44, %c0_45] : memref<8x32xbf16, #tpu.memory_space<vmem>>, vector<8x32xbf16>
    %c0_46 = arith.constant 0 : index
    %c0_47 = arith.constant 0 : index
    %121 = vector.load %arg10[%c0_46, %c0_47] : memref<32x32xbf16, #tpu.memory_space<vmem>>, vector<32x32xbf16>
    %cst_48 = arith.constant dense<0.000000e+00> : vector<8x32xf32>
    %122 = tpu.matmul %120, %121, %cst_48 {dimension_numbers = #tpu.dot_dimension_numbers<[1], [0], [0], [1], [0, 0, 1, 1], [], []>} : vector<8x32xbf16>, vector<32x32xbf16>, vector<8x32xf32> -> vector<8x32xf32>
    %c0_49 = arith.constant 0 : index
    %c0_50 = arith.constant 0 : index
    %123 = vector.load %arg11[%c0_49, %c0_50] : memref<1x32xf32, #tpu.memory_space<vmem>>, vector<1x32xf32>
    %124 = vector.broadcast %123 : vector<1x32xf32> to vector<8x32xf32>
    %125 = arith.addf %122, %124 : vector<8x32xf32>
    %126 = arith.addf %125, %0 : vector<8x32xf32>
    %c0_51 = arith.constant 0 : index
    %c0_52 = arith.constant 0 : index
    %127 = vector.load %arg12[%c0_51, %c0_52] : memref<1x32xf32, #tpu.memory_space<vmem>>, vector<1x32xf32>
    %c0_53 = arith.constant 0 : index
    %c0_54 = arith.constant 0 : index
    %128 = vector.load %arg13[%c0_53, %c0_54] : memref<1x32xf32, #tpu.memory_space<vmem>>, vector<1x32xf32>
    %cst_55 = arith.constant dense<0.000000e+00> : vector<8xf32>
    %129 = vector.multi_reduction <add>, %126, %cst_55 [1] : vector<8x32xf32> to vector<8xf32>
    %130 = vector.shape_cast %129 : vector<8xf32> to vector<8x1xf32>
    %cst_56 = arith.constant 3.200000e+01 : f32
    %131 = vector.broadcast %cst_56 : f32 to vector<8x1xf32>
    %132 = arith.divf %130, %131 : vector<8x1xf32>
    %133 = vector.broadcast %132 : vector<8x1xf32> to vector<8x32xf32>
    %134 = arith.subf %126, %133 : vector<8x32xf32>
    %135 = arith.mulf %134, %134 : vector<8x32xf32>
    %cst_57 = arith.constant dense<0.000000e+00> : vector<8xf32>
    %136 = vector.multi_reduction <add>, %135, %cst_57 [1] : vector<8x32xf32> to vector<8xf32>
    %137 = vector.shape_cast %136 : vector<8xf32> to vector<8x1xf32>
    %cst_58 = arith.constant 3.200000e+01 : f32
    %138 = vector.broadcast %cst_58 : f32 to vector<8x1xf32>
    %139 = arith.divf %137, %138 : vector<8x1xf32>
    %140 = vector.broadcast %132 : vector<8x1xf32> to vector<8x32xf32>
    %141 = arith.subf %126, %140 : vector<8x32xf32>
    %cst_59 = arith.constant 9.99999974E-6 : f32
    %142 = vector.broadcast %cst_59 : f32 to vector<8x1xf32>
    %143 = arith.addf %139, %142 : vector<8x1xf32>
    %144 = math.rsqrt %143 : vector<8x1xf32>
    %145 = vector.broadcast %144 : vector<8x1xf32> to vector<8x32xf32>
    %146 = arith.mulf %141, %145 : vector<8x32xf32>
    %147 = vector.broadcast %127 : vector<1x32xf32> to vector<8x32xf32>
    %148 = arith.mulf %146, %147 : vector<8x32xf32>
    %149 = vector.broadcast %128 : vector<1x32xf32> to vector<8x32xf32>
    %150 = arith.addf %148, %149 : vector<8x32xf32>
    %151 = arith.truncf %150 : vector<8x32xf32> to vector<8x32xbf16>
    %c0_60 = arith.constant 0 : index
    %c0_61 = arith.constant 0 : index
    %152 = vector.load %arg15[%c0_60, %c0_61] : memref<1x64xf32, #tpu.memory_space<vmem>>, vector<1x64xf32>
    %cst_62 = arith.constant 0.000000e+00 : f32
    %153 = vector.broadcast %cst_62 : f32 to vector<8x32xf32>
    %c0_63 = arith.constant 0 : index
    %c0_64 = arith.constant 0 : index
    %154 = vector.load %arg14[%c0_63, %c0_64] : memref<32x64xbf16, #tpu.memory_space<vmem>>, vector<32x64xbf16>
    %cst_65 = arith.constant dense<0.000000e+00> : vector<8x64xf32>
    %155 = tpu.matmul %151, %154, %cst_65 {dimension_numbers = #tpu.dot_dimension_numbers<[1], [0], [0], [1], [0, 0, 1, 1], [], []>} : vector<8x32xbf16>, vector<32x64xbf16>, vector<8x64xf32> -> vector<8x64xf32>
    %156 = vector.broadcast %152 : vector<1x64xf32> to vector<8x64xf32>
    %157 = arith.addf %155, %156 : vector<8x64xf32>
    %cst_66 = arith.constant 0.000000e+00 : f32
    %158 = vector.broadcast %cst_66 : f32 to vector<8x64xf32>
    %159 = arith.maximumf %157, %158 : vector<8x64xf32>
    %160 = arith.truncf %159 : vector<8x64xf32> to vector<8x64xbf16>
    %c0_67 = arith.constant 0 : index
    %c0_68 = arith.constant 0 : index
    %161 = vector.load %arg16[%c0_67, %c0_68] : memref<64x32xbf16, #tpu.memory_space<vmem>>, vector<64x32xbf16>
    %cst_69 = arith.constant dense<0.000000e+00> : vector<8x32xf32>
    %162 = tpu.matmul %160, %161, %cst_69 {dimension_numbers = #tpu.dot_dimension_numbers<[1], [0], [0], [1], [0, 0, 1, 1], [], []>} : vector<8x64xbf16>, vector<64x32xbf16>, vector<8x32xf32> -> vector<8x32xf32>
    %163 = arith.addf %153, %162 : vector<8x32xf32>
    %c0_70 = arith.constant 0 : index
    %c0_71 = arith.constant 0 : index
    %164 = vector.load %arg17[%c0_70, %c0_71] : memref<1x32xf32, #tpu.memory_space<vmem>>, vector<1x32xf32>
    %165 = vector.broadcast %164 : vector<1x32xf32> to vector<8x32xf32>
    %166 = arith.addf %163, %165 : vector<8x32xf32>
    %167 = arith.addf %166, %150 : vector<8x32xf32>
    %c0_72 = arith.constant 0 : index
    %c0_73 = arith.constant 0 : index
    %168 = vector.load %arg18[%c0_72, %c0_73] : memref<1x32xf32, #tpu.memory_space<vmem>>, vector<1x32xf32>
    %c0_74 = arith.constant 0 : index
    %c0_75 = arith.constant 0 : index
    %169 = vector.load %arg19[%c0_74, %c0_75] : memref<1x32xf32, #tpu.memory_space<vmem>>, vector<1x32xf32>
    %cst_76 = arith.constant dense<0.000000e+00> : vector<8xf32>
    %170 = vector.multi_reduction <add>, %167, %cst_76 [1] : vector<8x32xf32> to vector<8xf32>
    %171 = vector.shape_cast %170 : vector<8xf32> to vector<8x1xf32>
    %cst_77 = arith.constant 3.200000e+01 : f32
    %172 = vector.broadcast %cst_77 : f32 to vector<8x1xf32>
    %173 = arith.divf %171, %172 : vector<8x1xf32>
    %174 = vector.broadcast %173 : vector<8x1xf32> to vector<8x32xf32>
    %175 = arith.subf %167, %174 : vector<8x32xf32>
    %176 = arith.mulf %175, %175 : vector<8x32xf32>
    %cst_78 = arith.constant dense<0.000000e+00> : vector<8xf32>
    %177 = vector.multi_reduction <add>, %176, %cst_78 [1] : vector<8x32xf32> to vector<8xf32>
    %178 = vector.shape_cast %177 : vector<8xf32> to vector<8x1xf32>
    %cst_79 = arith.constant 3.200000e+01 : f32
    %179 = vector.broadcast %cst_79 : f32 to vector<8x1xf32>
    %180 = arith.divf %178, %179 : vector<8x1xf32>
    %181 = vector.broadcast %173 : vector<8x1xf32> to vector<8x32xf32>
    %182 = arith.subf %167, %181 : vector<8x32xf32>
    %cst_80 = arith.constant 9.99999974E-6 : f32
    %183 = vector.broadcast %cst_80 : f32 to vector<8x1xf32>
    %184 = arith.addf %180, %183 : vector<8x1xf32>
    %185 = math.rsqrt %184 : vector<8x1xf32>
    %186 = vector.broadcast %185 : vector<8x1xf32> to vector<8x32xf32>
    %187 = arith.mulf %182, %186 : vector<8x32xf32>
    %188 = vector.broadcast %168 : vector<1x32xf32> to vector<8x32xf32>
    %189 = arith.mulf %187, %188 : vector<8x32xf32>
    %190 = vector.broadcast %169 : vector<1x32xf32> to vector<8x32xf32>
    %191 = arith.addf %189, %190 : vector<8x32xf32>
    %c0_81 = arith.constant 0 : index
    %c0_82 = arith.constant 0 : index
    %192 = vector.load %arg20[%c0_81, %c0_82] : memref<8x32xf32, #tpu.memory_space<vmem>>, vector<8x32xf32>
    tpu.vector_store %arg20[%c0_81, %c0_82], %191 {strides = array<i32>} : memref<8x32xf32, #tpu.memory_space<vmem>>, vector<8x32xf32>,
    return
  }
  func.func @transform_0(%arg0: i32) -> (i32, i32) {
    %c0_i32 = arith.constant 0 : i32
    %c0_i32_0 = arith.constant 0 : i32
    return %arg0, %c0_i32 : i32, i32
  }
  func.func @transform_1(%arg0: i32) -> (i32, i32) {
    %c0_i32 = arith.constant 0 : i32
    %c0_i32_0 = arith.constant 0 : i32
    return %arg0, %c0_i32 : i32, i32
  }
  func.func @transform_2(%arg0: i32) -> (i32, i32) {
    %c0_i32 = arith.constant 0 : i32
    %c0_i32_0 = arith.constant 0 : i32
    return %arg0, %c0_i32 : i32, i32
  }
  func.func @transform_3(%arg0: i32) -> (i32, i32) {
    %c0_i32 = arith.constant 0 : i32
    %c0_i32_0 = arith.constant 0 : i32
    %c0_i32_1 = arith.constant 0 : i32
    return %c0_i32, %c0_i32_0 : i32, i32
  }
  func.func @transform_4(%arg0: i32) -> (i32, i32) {
    %c0_i32 = arith.constant 0 : i32
    %c0_i32_0 = arith.constant 0 : i32
    %c0_i32_1 = arith.constant 0 : i32
    return %c0_i32, %c0_i32_0 : i32, i32
  }
  func.func @transform_5(%arg0: i32) -> (i32, i32) {
    %c0_i32 = arith.constant 0 : i32
    %c0_i32_0 = arith.constant 0 : i32
    %c0_i32_1 = arith.constant 0 : i32
    return %c0_i32, %c0_i32_0 : i32, i32
  }
  func.func @transform_6(%arg0: i32) -> (i32, i32) {
    %c0_i32 = arith.constant 0 : i32
    %c0_i32_0 = arith.constant 0 : i32
    %c0_i32_1 = arith.constant 0 : i32
    return %c0_i32, %c0_i32_0 : i32, i32
  }
  func.func @transform_7(%arg0: i32) -> (i32, i32) {
    %c0_i32 = arith.constant 0 : i32
    %c0_i32_0 = arith.constant 0 : i32
    %c0_i32_1 = arith.constant 0 : i32
    return %c0_i32, %c0_i32_0 : i32, i32
  }
  func.func @transform_8(%arg0: i32) -> (i32, i32) {
    %c0_i32 = arith.constant 0 : i32
    %c0_i32_0 = arith.constant 0 : i32
    %c0_i32_1 = arith.constant 0 : i32
    return %c0_i32, %c0_i32_0 : i32, i32
  }
  func.func @transform_9(%arg0: i32) -> (i32, i32) {
    %c0_i32 = arith.constant 0 : i32
    %c0_i32_0 = arith.constant 0 : i32
    %c0_i32_1 = arith.constant 0 : i32
    return %c0_i32, %c0_i32_0 : i32, i32
  }
  func.func @transform_10(%arg0: i32) -> (i32, i32) {
    %c0_i32 = arith.constant 0 : i32
    %c0_i32_0 = arith.constant 0 : i32
    %c0_i32_1 = arith.constant 0 : i32
    return %c0_i32, %c0_i32_0 : i32, i32
  }
  func.func @transform_11(%arg0: i32) -> (i32, i32) {
    %c0_i32 = arith.constant 0 : i32
    %c0_i32_0 = arith.constant 0 : i32
    %c0_i32_1 = arith.constant 0 : i32
    return %c0_i32, %c0_i32_0 : i32, i32
  }
  func.func @transform_12(%arg0: i32) -> (i32, i32) {
    %c0_i32 = arith.constant 0 : i32
    %c0_i32_0 = arith.constant 0 : i32
    %c0_i32_1 = arith.constant 0 : i32
    return %c0_i32, %c0_i32_0 : i32, i32
  }
  func.func @transform_13(%arg0: i32) -> (i32, i32) {
    %c0_i32 = arith.constant 0 : i32
    %c0_i32_0 = arith.constant 0 : i32
    %c0_i32_1 = arith.constant 0 : i32
    return %c0_i32, %c0_i32_0 : i32, i32
  }
  func.func @transform_14(%arg0: i32) -> (i32, i32) {
    %c0_i32 = arith.constant 0 : i32
    %c0_i32_0 = arith.constant 0 : i32
    %c0_i32_1 = arith.constant 0 : i32
    return %c0_i32, %c0_i32_0 : i32, i32
  }
  func.func @transform_15(%arg0: i32) -> (i32, i32) {
    %c0_i32 = arith.constant 0 : i32
    %c0_i32_0 = arith.constant 0 : i32
    %c0_i32_1 = arith.constant 0 : i32
    return %c0_i32, %c0_i32_0 : i32, i32
  }
  func.func @transform_16(%arg0: i32) -> (i32, i32) {
    %c0_i32 = arith.constant 0 : i32
    %c0_i32_0 = arith.constant 0 : i32
    %c0_i32_1 = arith.constant 0 : i32
    return %c0_i32, %c0_i32_0 : i32, i32
  }
  func.func @transform_17(%arg0: i32) -> (i32, i32) {
    %c0_i32 = arith.constant 0 : i32
    %c0_i32_0 = arith.constant 0 : i32
    %c0_i32_1 = arith.constant 0 : i32
    return %c0_i32, %c0_i32_0 : i32, i32
  }
  func.func @transform_18(%arg0: i32) -> (i32, i32) {
    %c0_i32 = arith.constant 0 : i32
    %c0_i32_0 = arith.constant 0 : i32
    %c0_i32_1 = arith.constant 0 : i32
    return %c0_i32, %c0_i32_0 : i32, i32
  }
  func.func @transform_19(%arg0: i32) -> (i32, i32) {
    %c0_i32 = arith.constant 0 : i32
    %c0_i32_0 = arith.constant 0 : i32
    return %arg0, %c0_i32 : i32, i32
  }
}

</mosaic_0001>

<bundles_post_ra>
// kernel: tpu_custom_call.1
= control target key start
LH: loop header
LB: loop body
LE: loop exit
PB: predicated region body
PF: predicated region fallthrough
CT: control target
= control target key end

     0   :  { %s3136_s0 = inlined_call_operand.vmem [shape: f32[16,32], index: 0, kind: input, shape index: {}]   ;;  %s3137_s1 = inlined_call_operand.vmem [shape: f32[16,32], index: 1, kind: input, shape index: {}]   ;;  %s3138_s2 = inlined_call_operand.vmem [shape: f32[16,32], index: 2, kind: input, shape index: {}]   ;;  %s3139_s3 = inlined_call_operand.hbm [shape: bf16[32,32], index: 3, kind: input, shape index: {}]   ;;  %s3140_s4 = inlined_call_operand.vmem [shape: f32[1,32], index: 4, kind: input, shape index: {}]   ;;  %s3141_s5 = inlined_call_operand.hbm [shape: bf16[32,32], index: 5, kind: input, shape index: {}]   ;;  %s3142_s6 = inlined_call_operand.hbm [shape: f32[1,32], index: 6, kind: input, shape index: {}]   ;;  %s3143_s7 = inlined_call_operand.hbm [shape: bf16[32,32], index: 7, kind: input, shape index: {}]   ;;  %s3144_s8 = inlined_call_operand.hbm [shape: f32[1,32], index: 8, kind: input, shape index: {}]   ;;  %s3145_s9 = inlined_call_operand.vmem [shape: bf16[32,32], index: 9, kind: input, shape index: {}]   ;;  %s3146_s10 = inlined_call_operand.hbm [shape: f32[1,32], index: 10, kind: input, shape index: {}]   ;;  %s3147_s11 = inlined_call_operand.hbm [shape: f32[1,32], index: 11, kind: input, shape index: {}]   ;;  %s3148_s12 = inlined_call_operand.hbm [shape: f32[1,32], index: 12, kind: input, shape index: {}]   ;;  %s3149_s13 = inlined_call_operand.vmem [shape: bf16[32,64], index: 13, kind: input, shape index: {}]   ;;  %s3150_s14 = inlined_call_operand.vmem [shape: f32[1,64], index: 14, kind: input, shape index: {}]   ;;  %s3151_s15 = inlined_call_operand.vmem [shape: bf16[64,32], index: 15, kind: input, shape index: {}]   ;;  %s3152_s16 = inlined_call_operand.vmem [shape: f32[1,32], index: 16, kind: input, shape index: {}]   ;;  %s3153_s17 = inlined_call_operand.vmem [shape: f32[1,32], index: 17, kind: input, shape index: {}]   ;;  %s3154_s18 = inlined_call_operand.vmem [shape: f32[1,32], index: 18, kind: input, shape index: {}]   ;;  %s3155_s19 = inlined_call_operand.hbm [shape: f32[16,32], index: 19, kind: output, shape index: {}]  }
   0x1   :  { %3172 = sst [smem:[#allocation32_spill]] %s3136_s0 }
   0x2   :  { %3173 = sst [smem:[#allocation33_spill]] %s3137_s1 }
   0x3   :  { %3174 = sst [smem:[#allocation34_spill]] %s3138_s2 }
   0x4   :  { %3175 = sst [smem:[#allocation35_spill]] %s3139_s3 }
   0x5   :  { %3176 = sst [smem:[#allocation36_spill]] %s3141_s5 }
   0x6   :  { %3177 = sst [smem:[#allocation37_spill]] %s3153_s17 }
   0x7   :  { %3178 = sst [smem:[#allocation38_spill]] %s3154_s18 }
   0x8   :  { %3179 = sst [smem:[#allocation39_spill]] %s3155_s19 }
   0x9   :  { %24 = vsyncpa [#allocation4], 0 }
   0xa   :  { %25 = vsyncpa [#allocation7], 0 }
   0xb   :  { %26 = vsyncpa [#allocation10], 0 }
   0xc   :  { %27 = vsyncpa [#allocation13], 0 }
   0xd   :  { %28 = vsyncpa [#allocation16], 0 }
   0xe   :  { %29 = vsyncpa [#allocation5], 0 }
   0xf   :  { %31 = vsyncpa [#allocation5 + $0x1], 0  ;;  %s2677_s0 = smov 0   ;;  %s2679_s30 = smov 0  }
  0x10   :  { %s2681_s20 = smov 0   ;;  %s2683_s21 = smov 0  }
  0x11 LB: > { %3180 = sst [smem:[#allocation24_spill]] %s2544_s0  ;;  %s2698_s1 = sadd.s32 4294967295, %s2556_s21   ;;  %s2556_s21 = sphi %s2683_s21, %s3222_s21   ;;  %s2552_s20 = sphi %s2681_s20, %s3225_s20   ;;  %s2548_s30 = sphi %s2679_s30, %s3224_s30   ;;  %s2544_s0 = sphi %s2677_s0, %s3223_s0  }
  0x12   : > { %3181 = sst [smem:[#allocation25_spill]] %s2548_s30  ;;  %s1878_s22 = sadd.s32 4294967294, %s2556_s21  }
  0x13   : > { %3182 = sst [smem:[#allocation26_spill]] %s2552_s20  ;;  %s2702_s2 = sadd.s32 1, %s2556_s21  }
  0x14   : > { %3183 = sst [smem:[#allocation27_spill]] %s2556_s21  ;;  %s458_s23 = sadd.s32 1, %s2552_s20 }
  0x15   : > { %3184 = sst [smem:[#allocation28_spill]] %s2702_s2  ;;  %s455_s24 = ssub.s32 %s2556_s21, %s2702_s2 }
  0x16   : > { %p468_p0 = scmp.ne.s32.totalorder %s2552_s20, %s2548_s30  ;;  %p456_p1 = scmp.eq.s32.totalorder %s455_s24, 0 }
  0x17   : > { %p469_p2 = scmp.eq.s32.totalorder %s2698_s1, 1  ;;  %p474_p3 = scmp.ne.s32.totalorder %s2548_s30, %s2544_s0 }
  0x18   : > { %p475_p4 = scmp.eq.s32.totalorder %s1878_s22, 1  ;;  %p1879_p7 = scmp.ge.s32.totalorder %s2556_s21, 1 }
  0x19   : > { %s2713_s25 = scalar_select %p456_p1, %s2552_s20, %s458_s23  }
  0x1a   : > { %p2715_p5 = por %p469_p2, %p468_p0  ;;  %p2719_p6 = por %p475_p4, %p474_p3 }
  0x1b   : > { %3185 = sst [smem:[#allocation29_spill]] %s2713_s25  ;;  %p482_p8 = scmp.lt.s32.totalorder %s2556_s21, 3 }
  0x1c   : > { %s3186_s3 = scalar_select %p2715_p5, 1, 0 }
  0x1d   : > { %s3188_s26 = scalar_select %p2719_p6, 1, 0 }
  0x1e   : > { %3187 = sst [smem:[#allocation30_spill]] %s3186_s3  ;;  %p3164_p9 = scmp.eq.s32.totalorder %s2698_s1, 0 }
  0x1f   : > { %3189 = sst [smem:[#allocation31_spill]] %s3188_s26  ;;  %p2726_p10 = pnand %p1879_p7, %p482_p8 }
  0x20   : > { %s2558_s28 = smov [#allocation6]   ;;  %s2559_s23 = smov [#allocation9]  }
  0x21   : > { %s3190_s27 = scalar_select %p2726_p10, 1, 0 }
  0x22   : > { %p2120_p11 = pneg %p2726_p10  ;;  %s510_s29 = sshll.u32 %s2558_s28, 4  ;;  %s2732_s29 = int_to_ptr.vmem [resolvable:$true] %s510_s29 }
  0x23   : > { %s534_s24 = sshll.u32 %s2559_s23, 4  ;;  %s2560_s25 = smov [#allocation12]   ;;  %s2740_s24 = int_to_ptr.vmem [resolvable:$true] %s534_s24 }
  0x24   : > { %p2736_p12 = pnand %p3164_p9, %p2120_p11  ;;  %s2742_s20 = sshll.u32 %s2560_s25, 4  ;;  %s563_s20 = int_to_ptr.vmem [resolvable:$true] %s2742_s20 }
  0x25   : > { %s3192_s5 = sld [smem:[#allocation36_spill]] }
  0x26   : > { %p2752_p0 = pneg %p2736_p12 }
  0x2b   : > { %s2250_s0 = scalar_lea.hbm %s3192_s5, 256 }
  0x2c   : > { %p2251_p13 = scmp.ne.s32.totalorder %s3192_s5, %s2250_s0  ;;  %p2257_p3 = scmp.lt.u32.totalorder %s2250_s0, %s3192_s5 }
  0x2e   : > { %p2253_p1 = pnand %p2752_p0, %p2251_p13 }
  0x30   : > { %p2254_p2 = pneg %p2253_p1 }
  0x32   : > { %p2259_p4 = pnand %p2257_p3, %p2254_p2 }
  0x34   : > { %2262 = shalt.err (!%p2259_p4)
}
  0x35   : > { %s2263_s21 = scalar_lea.vmem %s2732_s29, 256  ;;  %p2271_p9 = scmp.lt.s32.totalorder %s2732_s29, %s2732_s29 }
  0x36   : > { %p2264_p7 = scmp.ne.s32.totalorder %s2732_s29, %s2263_s21  ;;  %p2272_p6 = scmp.lt.s32.totalorder %s2263_s21, %s2263_s21 }
  0x38   : > { %p2266_p8 = pnand %p2264_p7, %p2752_p0  ;;  %p2273_p13 = por %p2272_p6, %p2271_p9 }
  0x3a   : > { %p2267_p11 = pneg %p2266_p8 }
  0x3c   : > { %p2274_p1 = pnand %p2273_p13, %p2267_p11 }
  0x3e   : > { %2277 = shalt.err (!%p2274_p1)
}
  0x3f   : > { %s3170_s2 = smov 64   ;;  %s3171_s0 = smov 4  }
  0x40   : > { %2126 = dma.hbm_to_vmem [thread:$0]  (!%p2736_p12), %s3192_s5, 256, %s2732_s29, [#allocation7], %s3170_s2, %s3170_s2, %s3171_s0  }
  0x41   : > { %s2278_s21 = scalar_lea.hbm %s3143_s7, 256 }
  0x42   : > { %p2279_p6 = scmp.ne.s32.totalorder %s3143_s7, %s2278_s21  ;;  %p2285_p3 = scmp.lt.u32.totalorder %s2278_s21, %s3143_s7 }
  0x44   : > { %p2281_p9 = pnand %p2279_p6, %p2752_p0 }
  0x46   : > { %p2282_p2 = pneg %p2281_p9 }
  0x48   : > { %p2287_p4 = pnand %p2285_p3, %p2282_p2 }
  0x4a   : > { %2290 = shalt.err (!%p2287_p4)
}
  0x4b   : > { %s2291_s29 = scalar_lea.vmem %s2740_s24, 256  ;;  %p2299_p13 = scmp.lt.s32.totalorder %s2740_s24, %s2740_s24 }
  0x4c   : > { %p2292_p7 = scmp.ne.s32.totalorder %s2740_s24, %s2291_s29  ;;  %p2300_p1 = scmp.lt.s32.totalorder %s2291_s29, %s2291_s29 }
  0x4e   : > { %p2294_p8 = pnand %p2292_p7, %p2752_p0  ;;  %p2301_p6 = por %p2300_p1, %p2299_p13 }
  0x50   : > { %p2295_p11 = pneg %p2294_p8 }
  0x52   : > { %p2302_p9 = pnand %p2301_p6, %p2295_p11 }
  0x54   : > { %2305 = shalt.err (!%p2302_p9)
}
  0x55   : > { %2132 = dma.hbm_to_vmem [thread:$0]  (!%p2736_p12), %s3143_s7, 256, %s2740_s24, [#allocation10], %s3170_s2, %s3170_s2, %s3171_s0  }
  0x56   : > { %s2306_s26 = scalar_lea.hbm %s3146_s10, 16 }
  0x57   : > { %p2307_p2 = scmp.ne.s32.totalorder %s3146_s10, %s2306_s26  ;;  %p2313_p7 = scmp.lt.u32.totalorder %s2306_s26, %s3146_s10 }
  0x59   : > { %p2309_p3 = pnand %p2307_p2, %p2752_p0 }
  0x5b   : > { %p2310_p4 = pneg %p2309_p3 }
  0x5d   : > { %p2315_p8 = pnand %p2313_p7, %p2310_p4 }
  0x5f   : > { %2318 = shalt.err (!%p2315_p8)
}
  0x60   : > { %s2319_s29 = scalar_lea.vmem %s563_s20, 16  ;;  %s2326_s24 = scalar_lea.vmem %s563_s20, 32 }
  0x61   : > { %p2320_p11 = scmp.ne.s32.totalorder %s563_s20, %s2319_s29  ;;  %p2327_p6 = scmp.lt.s32.totalorder %s563_s20, %s563_s20 }
  0x62   : > { %p2328_p9 = scmp.lt.s32.totalorder %s2326_s24, %s2319_s29 }
  0x63   : > { %p2322_p13 = pnand %p2320_p11, %p2752_p0 }
  0x64   : > { %p2329_p5 = por %p2328_p9, %p2327_p6 }
  0x65   : > { %p2323_p1 = pneg %p2322_p13 }
  0x67   : > { %p2330_p10 = pnand %p2329_p5, %p2323_p1 }
  0x69   : > { %2333 = shalt.err (!%p2330_p10)
}
  0x6a   : > { %2138 = dma.hbm_to_vmem [thread:$0]  (!%p2736_p12), %s3146_s10, 16, %s563_s20, [#allocation13]  }
  0x6b   : > { %s2563_s30 = smov [#allocation3]   ;;  %s2564_s26 = smov [#allocation8]  }
  0x6c   : > { %s494_s3 = sshll.u32 %s2563_s30, 4  ;;  %s524_s28 = sshll.u32 %s2564_s26, 4  ;;  %s495_s3 = int_to_ptr.vmem [resolvable:$true] %s494_s3  ;;  %s525_s28 = int_to_ptr.vmem [resolvable:$true] %s524_s28 }
  0x6d   : > { %s3194_s21 = sld [smem:[#allocation35_spill]] }
  0x73   : > { %s3195_s2 = smov %s3194_s21  ;;  %s2334_s0 = scalar_lea.hbm %s3194_s21, 256 }
  0x74   : > { %p2335_p5 = scmp.ne.s32.totalorder %s3195_s2, %s2334_s0  ;;  %p2341_p3 = scmp.lt.u32.totalorder %s2334_s0, %s3195_s2 }
  0x76   : > { %p2337_p10 = pnand %p2335_p5, %p2752_p0 }
  0x78   : > { %p2338_p2 = pneg %p2337_p10 }
  0x7a   : > { %p2343_p4 = pnand %p2341_p3, %p2338_p2 }
  0x7c   : > { %2346 = shalt.err (!%p2343_p4)
}
  0x7d   : > { %s2347_s20 = scalar_lea.vmem %s495_s3, 256  ;;  %p2355_p13 = scmp.lt.s32.totalorder %s495_s3, %s495_s3 }
  0x7e   : > { %p2348_p7 = scmp.ne.s32.totalorder %s495_s3, %s2347_s20  ;;  %p2356_p1 = scmp.lt.s32.totalorder %s2347_s20, %s2347_s20 }
  0x80   : > { %p2350_p8 = pnand %p2348_p7, %p2752_p0  ;;  %p2357_p6 = por %p2356_p1, %p2355_p13 }
  0x82   : > { %p2351_p11 = pneg %p2350_p8 }
  0x84   : > { %p2358_p9 = pnand %p2357_p6, %p2351_p11 }
  0x86   : > { %2361 = shalt.err (!%p2358_p9)
}
  0x87   : > { %s3196_s18 = smov 4   ;;  %s3197_s30 = smov 64  }
  0x88   : > { %2123 = dma.hbm_to_vmem [thread:$0]  (!%p2736_p12), %s3195_s2, 256, %s495_s3, [#allocation4], %s3197_s30, %s3197_s30, %s3196_s18  }
  0x89   : > { %s2362_s25 = scalar_lea.hbm %s3142_s6, 16 }
  0x8a   : > { %p2363_p5 = scmp.ne.s32.totalorder %s3142_s6, %s2362_s25  ;;  %p2369_p3 = scmp.lt.u32.totalorder %s2362_s25, %s3142_s6 }
  0x8c   : > { %p2365_p10 = pnand %p2363_p5, %p2752_p0 }
  0x8e   : > { %p2366_p2 = pneg %p2365_p10 }
  0x90   : > { %p2371_p4 = pnand %p2369_p3, %p2366_p2 }
  0x92   : > { %2374 = shalt.err (!%p2371_p4)
}
  0x93   : > { %s2375_s20 = scalar_lea.vmem %s525_s28, 16  ;;  %s2382_s3 = scalar_lea.vmem %s525_s28, 32 }
  0x94   : > { %p2376_p7 = scmp.ne.s32.totalorder %s525_s28, %s2375_s20  ;;  %p2383_p13 = scmp.lt.s32.totalorder %s525_s28, %s525_s28 }
  0x95   : > { %p2384_p1 = scmp.lt.s32.totalorder %s2382_s3, %s2375_s20 }
  0x96   : > { %p2378_p8 = pnand %p2376_p7, %p2752_p0 }
  0x97   : > { %p2385_p6 = por %p2384_p1, %p2383_p13 }
  0x98   : > { %p2379_p11 = pneg %p2378_p8 }
  0x9a   : > { %p2386_p9 = pnand %p2385_p6, %p2379_p11 }
  0x9c   : > { %2389 = shalt.err (!%p2386_p9)
}
  0x9d   : > { %2129 = dma.hbm_to_vmem [thread:$0]  (!%p2736_p12), %s3142_s6, 16, %s525_s28, [#allocation7]  }
  0x9e   : > { %s2565_s5 = smov [#allocation11]   ;;  %s2566_s26 = smov [#allocation14]  }
  0x9f   : > { %s548_s0 = sshll.u32 %s2565_s5, 4  ;;  %s573_s23 = sshll.u32 %s2566_s26, 4  ;;  %s549_s0 = int_to_ptr.vmem [resolvable:$true] %s548_s0  ;;  %s574_s23 = int_to_ptr.vmem [resolvable:$true] %s573_s23 }
  0xa0   : > { %s2390_s29 = scalar_lea.hbm %s3144_s8, 16 }
  0xa1   : > { %p2391_p5 = scmp.ne.s32.totalorder %s3144_s8, %s2390_s29  ;;  %p2397_p3 = scmp.lt.u32.totalorder %s2390_s29, %s3144_s8 }
  0xa3   : > { %p2393_p10 = pnand %p2391_p5, %p2752_p0 }
  0xa5   : > { %p2394_p2 = pneg %p2393_p10 }
  0xa7   : > { %p2399_p4 = pnand %p2397_p3, %p2394_p2 }
  0xa9   : > { %2402 = shalt.err (!%p2399_p4)
}
  0xaa   : > { %s2403_s28 = scalar_lea.vmem %s549_s0, 16  ;;  %s2410_s18 = scalar_lea.vmem %s549_s0, 32 }
  0xab   : > { %p2404_p7 = scmp.ne.s32.totalorder %s549_s0, %s2403_s28  ;;  %p2411_p13 = scmp.lt.s32.totalorder %s549_s0, %s549_s0 }
  0xac   : > { %p2412_p1 = scmp.lt.s32.totalorder %s2410_s18, %s2403_s28 }
  0xad   : > { %p2406_p8 = pnand %p2404_p7, %p2752_p0 }
  0xae   : > { %p2413_p6 = por %p2412_p1, %p2411_p13 }
  0xaf   : > { %p2407_p11 = pneg %p2406_p8 }
  0xb1   : > { %p2414_p9 = pnand %p2413_p6, %p2407_p11 }
  0xb3   : > { %2417 = shalt.err (!%p2414_p9)
}
  0xb4   : > { %2135 = dma.hbm_to_vmem [thread:$0]  (!%p2736_p12), %s3144_s8, 16, %s549_s0, [#allocation10]  }
  0xb5   : > { %s2418_s21 = scalar_lea.hbm %s3147_s11, 16 }
  0xb6   : > { %p2419_p5 = scmp.ne.s32.totalorder %s3147_s11, %s2418_s21  ;;  %p2425_p3 = scmp.lt.u32.totalorder %s2418_s21, %s3147_s11 }
  0xb8   : > { %p2421_p10 = pnand %p2419_p5, %p2752_p0 }
  0xba   : > { %p2422_p2 = pneg %p2421_p10 }
  0xbc   : > { %p2427_p4 = pnand %p2425_p3, %p2422_p2 }
  0xbe   : > { %2430 = shalt.err (!%p2427_p4)
}
  0xbf   : > { %s2431_s3 = scalar_lea.vmem %s574_s23, 16  ;;  %s2438_s0 = scalar_lea.vmem %s574_s23, 32 }
  0xc0   : > { %p2432_p7 = scmp.ne.s32.totalorder %s574_s23, %s2431_s3  ;;  %p2439_p13 = scmp.lt.s32.totalorder %s574_s23, %s574_s23 }
  0xc1   : > { %p2440_p1 = scmp.lt.s32.totalorder %s2438_s0, %s2431_s3 }
  0xc2   : > { %p2434_p8 = pnand %p2432_p7, %p2752_p0 }
  0xc3   : > { %p2441_p6 = por %p2440_p1, %p2439_p13 }
  0xc4   : > { %p2435_p11 = pneg %p2434_p8 }
  0xc6   : > { %p2442_p9 = pnand %p2441_p6, %p2435_p11 }
  0xc8   : > { %2445 = shalt.err (!%p2442_p9)
}
  0xc9   : > { %2141 = dma.hbm_to_vmem [thread:$0]  (!%p2736_p12), %s3147_s11, 16, %s574_s23, [#allocation13]  }
  0xca   : > { %s2567_s30 = smov [#allocation15]   ;;  %s2446_s21 = scalar_lea.hbm %s3148_s12, 16 }
  0xcb   : > { %s584_s5 = sshll.u32 %s2567_s30, 4  ;;  %p2447_p5 = scmp.ne.s32.totalorder %s3148_s12, %s2446_s21  ;;  %s585_s5 = int_to_ptr.vmem [resolvable:$true] %s584_s5 }
  0xcc   : > { %p2453_p3 = scmp.lt.u32.totalorder %s2446_s21, %s3148_s12 }
  0xcd   : > { %p2449_p10 = pnand %p2447_p5, %p2752_p0 }
  0xcf   : > { %p2450_p2 = pneg %p2449_p10 }
  0xd1   : > { %p2455_p4 = pnand %p2453_p3, %p2450_p2 }
  0xd3   : > { %2458 = shalt.err (!%p2455_p4)
}
  0xd4   : > { %s2459_s23 = scalar_lea.vmem %s585_s5, 16  ;;  %s2466_s3 = scalar_lea.vmem %s585_s5, 32 }
  0xd5   : > { %p2460_p7 = scmp.ne.s32.totalorder %s585_s5, %s2459_s23  ;;  %p2467_p13 = scmp.lt.s32.totalorder %s585_s5, %s585_s5 }
  0xd6   : > { %p2468_p1 = scmp.lt.s32.totalorder %s2466_s3, %s2459_s23 }
  0xd7   : > { %p2462_p8 = pnand %p2460_p7, %p2752_p0 }
  0xd8   : > { %p2469_p6 = por %p2468_p1, %p2467_p13 }
  0xd9   : > { %p2463_p11 = pneg %p2462_p8 }
  0xdb   : > { %p2470_p9 = pnand %p2469_p6, %p2463_p11 }
  0xdd   : > { %2473 = shalt.err (!%p2470_p9)
}
  0xde   : > { %2144 = dma.hbm_to_vmem [thread:$0]  (!%p2736_p12), %s3148_s12, 16, %s585_s5, [#allocation16]  }
  0xdf   : > { %p3198_p5 = scmp.ne.s32.totalorder %s3190_s27, 0 }
  0xe0   : > { %p3199_p10 = scmp.eq.s32.totalorder (!%p3198_p5), %s2698_s1, 0 }
  0xe1   : > { %636 = sbr.rel (%p3198_p5) target bundleno = 2772 (0xad4), region = 96 }
  0xe8   : > { %2519 = dma.done.wait (%p3199_p10), [#allocation4], 256   ;;  %p3200_p0 = pmov %p3199_p10 }
  0xea   : > { %2521 = vsyncadd (%p3200_p0), [#allocation4], 4294967040  ;;  %p3201_p2 = pmov %p3200_p0 }
  0xeb   : > { %p3202_p3 = pmov %p3200_p0 }
  0xec   : > { %2523 = dma.done.wait (%p3201_p2), [#allocation7], 272  }
  0xed   : > { %2525 = vsyncadd (%p3202_p3), [#allocation7], 4294967024  ;;  %p3203_p4 = pmov %p3200_p0 }
  0xee   : > { %p3204_p12 = pmov %p3200_p0 }
  0xef   : > { %2527 = dma.done.wait (%p3203_p4), [#allocation10], 272  }
  0xf0   : > { %2529 = vsyncadd (%p3204_p12), [#allocation10], 4294967024  ;;  %p3205_p7 = pmov %p3200_p0 }
  0xf1   : > { %p3206_p8 = pmov %p3200_p0 }
  0xf2   : > { %2531 = dma.done.wait (%p3205_p7), [#allocation13], 32  }
  0xf3   : > { %2533 = vsyncadd (%p3206_p8), [#allocation13], 4294967264  ;;  %p3207_p11 = pmov %p3200_p0 }
  0xf4   : > { %p3208_p13 = pmov %p3200_p0 }
  0xf5   : > { %2535 = dma.done.wait (%p3207_p11), [#allocation16], 16  }
  0xf6   : > { %2537 = vsyncadd (%p3208_p13), [#allocation16], 4294967280  ;;  %p727_p1 = scmp.lt.s32.totalorder %s2698_s1, 1  ;;  %v2568_v0 = vmov 0.0   ;;  %vm2569_vm0 = vmmov 0   ;;  %v2216_v1 = vld [vmem:[#allocation6] sm:$0xff]  }
  0xf7   : > { %1994 = vmatprep.subr.bf16.mxu1 %v2568_v0  ;;  %1986 = vmatprep.subr.bf16.mxu0 %v2568_v0  ;;  %s3209_s30 = sld [smem:[#allocation33_spill]]  ;;  %v2217_v2 = vld [vmem:[#allocation3] sm:$0xff]   ;;  %s3210_s21 = sld [smem:[#allocation32_spill]]  ;;  %v2218_v3 = vld [vmem:[#allocation6 + $0x8] sm:$0xff]   ;;  %vm766_vm1 = vcmask 261120   ;;  %v2219_v5 = vld [vmem:[#allocation3 + $0x8] sm:$0xff]  }
  0xf8   : > { %1998 = vmatprep.mubr.msk.bf16.mxu1 %vm2569_vm0, %v2568_v0  ;;  %s728_s19 = scalar_select %p727_p1, %s2698_s1, 1  ;;  %1990 = vmatprep.mubr.msk.bf16.mxu0 %vm2569_vm0, %v2568_v0  ;;  %v1906_v9 = vld [vmem:[#allocation8] ss:$0 sm:$0xff]  ;;  %v1902_v10 = vld [vmem:[%s3140_s4] ss:$0 sm:$0xff]  ;;  %vm948_vm2 = vcmask 64512  }
  0xf9   : > { %1995 = vmatpush3.bf16.msra.mxu1 %v2216_v1  ;;  %1987 = vmatpush3.bf16.msra.mxu0 %v2217_v2  ;;  %s2570_s20 = smov 112   ;;  %s2571_s23 = smov 120   ;;  %v2220_v24 = vld [vmem:[#allocation9] sm:$0xff]   ;;  %v2221_v25 = vld [vmem:[#allocation9 + $0x8] sm:$0xff]   ;;  %v1910_v43 = vld [vmem:[#allocation11] ss:$0 sm:$0xff] }
  0xfa   : > { %s2944_s27 = sshll.u32 %s728_s19, 3  ;;  %1996 = vmatprep.subr.bf16.mxu1 %v2568_v0  ;;  %1988 = vmatprep.subr.bf16.mxu0 %v2568_v0  ;;  %s2572_s3 = smov 104   ;;  %vm1011_vm3 = vcmask 1043456   ;;  %vm1056_vm4 = vcmask 60416   ;;  %vm1179_vm5 = vcmask 126016   ;;  %vm1299_vm6 = vcmask 191616  }
  0xfb   : > { %s3211_s19 = sld [smem:[#allocation34_spill]]  ;;  %s2574_s25 = smov 16   ;;  %vm1419_vm7 = vcmask 257216   ;;  %vm1627_vm8 = vcmask 523264  }
  0xfc   : > { %s3213_s17 = sld [smem:[#allocation30_spill]]  ;;  %s3216_s26 = sld [smem:[#allocation39_spill]] }
  0xfd   : > { %s734_s5 = scalar_lea.vmem %s3209_s30, %s2944_s27  ;;  %s730_s29 = scalar_lea.vmem %s3210_s21, %s2944_s27  ;;  %1997 = vmatpush3.bf16.msra.mxu1 %v2218_v3  ;;  %1989 = vmatpush3.bf16.msra.mxu0 %v2219_v5 }
  0xfe   : > { %v810_v4 = vld [vmem:[%s734_s5] sm:$0xff]  ;;  %2010 = vmatprep.subr.bf16.mxu1 %v2568_v0  ;;  %2002 = vmatprep.subr.bf16.mxu0 %v2568_v0  ;;  %s2575_s21 = smov 24  }
  0xff   : > { %v741_v6 = vld [vmem:[%s730_s29] sm:$0xff]  ;;  %v811_v7 = vpack.c.bf16 %v810_v4, %v810_v4 }
 0x100   : > { %v742_v8 = vpack.c.bf16 %v741_v6, %v741_v6 }
 0x101   : > { %1999 = vmatmul.mubr.msk.bf16.vlgmr.msra.gmra.mrb[0].mxu1 %vm766_vm1, %v811_v7  ;;  %s738_s22 = scalar_lea.vmem %s3211_s19, %s2944_s27  ;;  %s2573_s27 = smov 8  }
 0x102   : > { %1991 = vmatmul.mubr.msk.bf16.vlgmr.msra.gmra.mrb[0].mxu0 %vm766_vm1, %v742_v8  ;;  %2012 = vmatprep.mubr.msk.bf16.mxu1 %vm2569_vm0, %v2568_v0  ;;  %v2982_v26 = vld [vmem:[%s738_s22] sm:$0xff]  ;;  %s3215_s19 = sld [smem:[#allocation38_spill]]  ;;  %s1944_s22 = sshll.u32 %s2698_s1, 7 }
 0x103   : > { %2006 = vmatprep.mubr.msk.bf16.mxu0 %vm2569_vm0, %v2568_v0  ;;  %2003 = vmatpush3.bf16.msra.mxu0 %v2220_v24  ;;  %v878_v27 = vpack.c.bf16 %v2982_v26, %v2982_v26  ;;  %p3217_p9 = scmp.ne.s32.totalorder %s3213_s17, 0  ;;  %s2576_s1 = smov [#allocation17]  }
 0x104   : > { %2004 = vmatprep.subr.bf16.mxu0 %v2568_v0 }
 0x107   : > { %2005 = vmatpush3.bf16.msra.mxu0 %v2221_v25 }
 0x108   : > { %2016 = vmatprep.subr.bf16.mxu0 %v2568_v0 }
 0x10a   : > { %2007 = vmatmul.mubr.msk.bf16.vlgmr.msra.gmra.mrb[4].mxu0 %vm766_vm1, %v878_v27 }
 0x10b   : > { %2018 = vmatprep.mubr.msk.bf16.mxu0 %vm2569_vm0, %v2568_v0 }
 0x1d4   : > { %v872_v11 = vpop.f32.mrb[0].mxu1 }
 0x1d5   : > { %v873_v12 = vadd.f32 %v1906_v9, %v872_v11  ;;  %v2000_v13 = vpop.f32.mrb[1].mxu1  ;;  %v804_v14 = vpop.f32.mrb[0].mxu0 }
 0x1d6   : > { %v875_v15 = vpop.f32.mrb[2].mxu1  ;;  %v805_v16 = vadd.f32 %v1902_v10, %v804_v14  ;;  %v1992_v17 = vpop.f32.mrb[1].mxu0 }
 0x1d7   : > { %v946_v18 = vpack.c.bf16 %v873_v12, %v873_v12  ;;  %v2001_v19 = vpop.f32.mrb[3].mxu1  ;;  %v807_v20 = vpop.f32.mrb[2].mxu0 }
 0x1d8   : > { %v1993_v21 = vpop.f32.mrb[3].mxu0  ;;  %v945_v22 = vpack.c.bf16 %v805_v16, %v805_v16 }
 0x1d9   : > { %1183 = vrot.lane.b32.xlu1 %v946_v18, %s2570_s20  ;;  %1062 = vrot.lane.b32.xlu0 %v946_v18, %s2571_s23  ;;  %v953_v23 = vsel %vm948_vm2, %v946_v18, 0 }
 0x1da   : > { %2011 = vmatpush3.bf16.xpose.msra.mxu1 %v953_v23 }
 0x1db   : > { %2022 = vmatprep.subr.bf16.mxu1 %v2568_v0 }
 0x1dd   : > { %1181 = vrot.lane.b32.xlu1 %v945_v22, %s2570_s20  ;;  %1059 = vrot.lane.b32.xlu0 %v945_v22, %s2571_s23  ;;  %v939_v44 = vpop.f32.mrb[4].mxu0 }
 0x1de   : > { %v940_v45 = vadd.f32 %v1910_v43, %v939_v44  ;;  %v2008_v46 = vpop.f32.mrb[5].mxu0 }
 0x1df   : > { %v942_v47 = vpop.f32.mrb[6].mxu0 }
 0x1e0   : > { %v947_v48 = vpack.c.bf16 %v940_v45, %v940_v45  ;;  %v2009_v49 = vpop.f32.mrb[7].mxu0 }
 0x1e1   : > { %1301 = vrot.lane.b32.xlu1 %v945_v22, %s2572_s3  ;;  %1303 = vrot.lane.b32.xlu0 %v946_v18, %s2572_s3 }
 0x1e2   : > { %2013 = vmatmul.mubr.msk.bf16.vlgmr.msra.gmra.mrb[4].mxu1 %vm948_vm2, %v945_v22  ;;  %v1013_v50 = vsel %vm1011_vm3, %v947_v48, 0 }
 0x1e3   : > { %2024 = vmatprep.mubr.msk.bf16.mxu1 %vm2569_vm0, %v2568_v0  ;;  %2017 = vmatpush3.bf16.msra.mxu0 %v1013_v50 }
 0x1e4   : > { %2028 = vmatprep.subr.bf16.mxu0 %v2568_v0 }
 0x24b   : > { %v1063_v28 = vpop.permute.xlu0 %1062  ;;  %v1184_v30 = vpop.permute.xlu1 %1183 }
 0x24c   : > { %v1068_v29 = vsel %vm948_vm2, %v1063_v28, 0  ;;  %v1189_v32 = vsel %vm948_vm2, %v1184_v30, 0 }
 0x24d   : > { %2023 = vmatpush3.bf16.xpose.msra.mxu1 %v1068_v29 }
 0x24e   : > { %2034 = vmatprep.subr.bf16.mxu1 %v2568_v0 }
 0x24f   : > { %v1060_v31 = vpop.permute.xlu0 %1059  ;;  %v1182_v34 = vpop.permute.xlu1 %1181 }
 0x253   : > { %v1304_v33 = vpop.permute.xlu0 %1303  ;;  %v1302_v36 = vpop.permute.xlu1 %1301 }
 0x254   : > { %2025 = vmatmul.mubr.msk.bf16.vlgmr.msra.gmra.mrb[8].mxu1 %vm948_vm2, %v1060_v31  ;;  %v1309_v35 = vsel %vm948_vm2, %v1304_v33, 0 }
 0x255   : > { %2035 = vmatpush3.bf16.xpose.msra.mxu1 %v1189_v32  ;;  %2036 = vmatprep.mubr.msk.bf16.mxu1 %vm2569_vm0, %v2568_v0 }
 0x256   : > { %2046 = vmatprep.subr.bf16.mxu1 %v2568_v0 }
 0x25c   : > { %2037 = vmatmul.mubr.msk.bf16.vlgmr.msra.gmra.mrb[12].mxu1 %vm948_vm2, %v1182_v34 }
 0x25d   : > { %2047 = vmatpush3.bf16.xpose.msra.mxu1 %v1309_v35  ;;  %2048 = vmatprep.mubr.msk.bf16.mxu1 %vm2569_vm0, %v2568_v0 }
 0x25e   : > { %2058 = vmatprep.subr.bf16.mxu1 %v2568_v0 }
 0x264   : > { %2049 = vmatmul.mubr.msk.bf16.vlgmr.msra.gmra.mrb[16].mxu1 %vm948_vm2, %v1302_v36 }
 0x265   : > { %2062 = vmatprep.mubr.msk.bf16.mxu1 %vm2569_vm0, %v2568_v0 }
 0x2b5   : > { %v989_v37 = vpop.f32.mrb[4].mxu1 }
 0x2b6   : > { %v995_v38 = vmul.f32 0.35355338, %v989_v37  ;;  %v2014_v39 = vpop.f32.mrb[5].mxu1 }
 0x2b7   : > { %v992_v40 = vpop.f32.mrb[6].mxu1 }
 0x2b8   : > { %v2015_v41 = vpop.f32.mrb[7].mxu1  ;;  %v996_v42 = vsel %vm948_vm2, %v995_v38, -inf }
 0x2b9   : > { %997 = vmax.xlane.f32.xlu0 %v996_v42 }
 0x327   : > { %v1104_v51 = vpop.f32.mrb[8].mxu1 }
 0x328   : > { %v1110_v52 = vmul.f32 0.35355338, %v1104_v51  ;;  %v2026_v53 = vpop.f32.mrb[9].mxu1 }
 0x329   : > { %v1107_v54 = vpop.f32.mrb[10].mxu1 }
 0x32a   : > { %v2027_v55 = vpop.f32.mrb[11].mxu1  ;;  %v1111_v56 = vsel %vm948_vm2, %v1110_v52, -inf }
 0x32b   : > { %1112 = vmax.xlane.f32.xlu1 %v1111_v56 }
 0x32f   : > { %v1225_v57 = vpop.f32.mrb[12].mxu1 }
 0x330   : > { %v1231_v58 = vmul.f32 0.35355338, %v1225_v57  ;;  %v2038_v59 = vpop.f32.mrb[13].mxu1 }
 0x331   : > { %v1228_v60 = vpop.f32.mrb[14].mxu1  ;;  %v2222_v59 = vld [vmem:[%s3145_s9] sm:$0xff]  }
 0x332   : > { %v2039_v61 = vpop.f32.mrb[15].mxu1  ;;  %v1232_v62 = vsel %vm948_vm2, %v1231_v58, -inf  ;;  %2059 = vmatpush3.bf16.msra.mxu1 %v2222_v59 }
 0x333   : > { %1233 = vmax.xlane.f32.xlu0 %v1232_v62  ;;  %v2223_v61 = vld [vmem:[%s3145_s9 + $0x8] sm:$0xff]   ;;  %2060 = vmatprep.subr.bf16.mxu1 %v2568_v0 }
 0x336   : > { %2061 = vmatpush3.bf16.msra.mxu1 %v2223_v61 }
 0x337   : > { %v1345_v63 = vpop.f32.mrb[16].mxu1  ;;  %2074 = vmatprep.subr.bf16.mxu1 %v2568_v0 }
 0x338   : > { %v1351_v1 = vmul.f32 0.35355338, %v1345_v63  ;;  %v2050_v2 = vpop.f32.mrb[17].mxu1 }
 0x339   : > { %v1348_v3 = vpop.f32.mrb[18].mxu1 }
 0x33a   : > { %v2051_v4 = vpop.f32.mrb[19].mxu1  ;;  %v1352_v5 = vsel %vm948_vm2, %v1351_v1, -inf }
 0x33b   : > { %1353 = vmax.xlane.f32.xlu0 %v1352_v5 }
 0x346   : > { %v998_v6 = vpop.xlane.xlu0 %997 }
 0x347   : > { %v999_v7 = vsub.f32 %v995_v38, %v998_v6 }
 0x349   : > { %v1000_v8 = vmul.f32 1.442695, %v999_v7 }
 0x34b   : > { %2230 = vpow2.f32 %v1000_v8 }
 0x355   : > { %v2231_v9 = vpop.eup %2230 }
 0x356   : > { %v1002_v10 = vsel %vm948_vm2, %v2231_v9, 0.0 }
 0x357   : > { %1003 = vadd.xlane.f32.xlu1 %v1002_v10 }
 0x368   : > { %1124 = vrot.lane.b32.xlu1 %v947_v48, %s2571_s23 }
 0x3b8   : > { %v1113_v11 = vpop.xlane.xlu1 %1112 }
 0x3b9   : > { %v1114_v12 = vsub.f32 %v1110_v52, %v1113_v11 }
 0x3bb   : > { %v1115_v13 = vmul.f32 1.442695, %v1114_v12  ;;  %v1925_v12 = vld [vmem:[#allocation12] ss:$0 sm:$0xff] }
 0x3bd   : > { %2232 = vpow2.f32 %v1115_v13 }
 0x3c0   : > { %v1234_v14 = vpop.xlane.xlu0 %1233 }
 0x3c1   : > { %v1235_v15 = vsub.f32 %v1231_v58, %v1234_v14 }
 0x3c3   : > { %v1236_v16 = vmul.f32 1.442695, %v1235_v15 }
 0x3c5   : > { %2234 = vpow2.f32 %v1236_v16 }
 0x3c7   : > { %v2233_v17 = vpop.eup %2232 }
 0x3c8   : > { %v1354_v18 = vpop.xlane.xlu0 %1353  ;;  %v1117_v19 = vsel %vm948_vm2, %v2233_v17, 0.0 }
 0x3c9   : > { %v1355_v20 = vsub.f32 %v1351_v1, %v1354_v18  ;;  %1118 = vadd.xlane.f32.xlu0 %v1117_v19 }
 0x3cb   : > { %v1356_v21 = vmul.f32 1.442695, %v1355_v20 }
 0x3cd   : > { %2236 = vpow2.f32 %v1356_v21 }
 0x3cf   : > { %v2235_v22 = vpop.eup %2234 }
 0x3d0   : > { %v1238_v23 = vsel %vm948_vm2, %v2235_v22, 0.0 }
 0x3d1   : > { %1239 = vadd.xlane.f32.xlu1 %v1238_v23 }
 0x3d7   : > { %v2237_v24 = vpop.eup %2236 }
 0x3d8   : > { %v1358_v25 = vsel %vm948_vm2, %v2237_v24, 0.0 }
 0x3d9   : > { %1359 = vadd.xlane.f32.xlu0 %v1358_v25  ;;  %v2224_v25 = vld [vmem:[%s3149_s13] sm:$0xff]  }
 0x3e2   : > { %1364 = vrot.lane.b32.xlu1 %v947_v48, %s2572_s3  ;;  %s3214_s3 = sld [smem:[#allocation37_spill]] }
 0x3e4   : > { %v1004_v27 = vpop.xlane.xlu1 %1003 }
 0x3e5   : > { %2238 = vrcp.f32 %v1004_v27  ;;  %v2225_v27 = vld [vmem:[%s3149_s13 + $0x8] sm:$0xff]  }
 0x3e8   : > { %v1125_v29 = vpop.permute.xlu1 %1124 }
 0x3e9   : > { %v1130_v32 = vsel %vm1011_vm3, %v1125_v29, 0 }
 0x3ef   : > { %v2239_v28 = vpop.eup %2238  ;;  %1244 = vrot.lane.b32.xlu0 %v947_v48, %s2570_s20 }
 0x3f0   : > { %v1006_v30 = vmul.f32 %v2239_v28, %v2231_v9  ;;  %v2227_v28 = vld [vmem:[%s3151_s15 + $0x8] sm:$0xff]  }
 0x3f2   : > { %v1007_v31 = vpack.c.bf16 %v1006_v30, %v1006_v30 }
 0x3f4   : > { %2019 = vmatmul.mubr.msk.bf16.vlgmr.msra.gmra.mrb[8].mxu0 %vm948_vm2, %v1007_v31 }
 0x3f5   : > { %2029 = vmatpush3.bf16.msra.mxu0 %v1130_v32  ;;  %2030 = vmatprep.mubr.msk.bf16.mxu0 %vm2569_vm0, %v2568_v0 }
 0x3f6   : > { %2040 = vmatprep.subr.bf16.mxu0 %v2568_v0 }
 0x456   : > { %v1119_v33 = vpop.xlane.xlu0 %1118 }
 0x457   : > { %2240 = vrcp.f32 %v1119_v33  ;;  %v1929_v33 = vld [vmem:[#allocation14] ss:$0 sm:$0xff] }
 0x45e   : > { %v1240_v34 = vpop.xlane.xlu1 %1239 }
 0x45f   : > { %2242 = vrcp.f32 %v1240_v34 }
 0x461   : > { %v2241_v35 = vpop.eup %2240 }
 0x462   : > { %v1121_v36 = vmul.f32 %v2241_v35, %v2233_v17  ;;  %v1365_v43 = vpop.permute.xlu1 %1364  ;;  %v1930_v35 = vld [vmem:[#allocation15] ss:$0 sm:$0xff] }
 0x463   : > { %v1370_v45 = vsel %vm1011_vm3, %v1365_v43, 0 }
 0x464   : > { %v1122_v37 = vpack.c.bf16 %v1121_v36, %v1121_v36 }
 0x466   : > { %v1360_v38 = vpop.xlane.xlu0 %1359  ;;  %2031 = vmatmul.mubr.msk.bf16.vlgmr.msra.gmra.mrb[12].mxu0 %vm948_vm2, %v1122_v37 }
 0x467   : > { %2244 = vrcp.f32 %v1360_v38  ;;  %2042 = vmatprep.mubr.msk.bf16.mxu0 %vm2569_vm0, %v2568_v0 }
 0x469   : > { %v2243_v39 = vpop.eup %2242 }
 0x46a   : > { %v1242_v40 = vmul.f32 %v2243_v39, %v2235_v22  ;;  %v1245_v41 = vpop.permute.xlu0 %1244  ;;  %v2228_v39 = vld [vmem:[%s3151_s15 + $0x10] sm:$0xff]  }
 0x46b   : > { %v1250_v42 = vsel %vm1011_vm3, %v1245_v41, 0  ;;  %v1931_v41 = vld [vmem:[%s3150_s14] ss:$0 sm:$0xff] }
 0x46c   : > { %2041 = vmatpush3.bf16.msra.mxu0 %v1250_v42  ;;  %v1243_v44 = vpack.c.bf16 %v1242_v40, %v1242_v40  ;;  %v2229_v40 = vld [vmem:[%s3151_s15 + $0x18] sm:$0xff]  }
 0x46d   : > { %2052 = vmatprep.subr.bf16.mxu0 %v2568_v0 }
 0x46f   : > { %2043 = vmatmul.mubr.msk.bf16.vlgmr.msra.gmra.mrb[16].mxu0 %vm948_vm2, %v1243_v44 }
 0x470   : > { %2053 = vmatpush3.bf16.msra.mxu0 %v1370_v45  ;;  %2054 = vmatprep.mubr.msk.bf16.mxu0 %vm2569_vm0, %v2568_v0 }
 0x471   : > { %v2245_v46 = vpop.eup %2244  ;;  %2066 = vmatprep.subr.bf16.mxu0 %v2568_v0 }
 0x472   : > { %v1362_v47 = vmul.f32 %v2245_v46, %v2237_v24 }
 0x474   : > { %v1363_v48 = vpack.c.bf16 %v1362_v47, %v1362_v47 }
 0x477   : > { %2055 = vmatmul.mubr.msk.bf16.vlgmr.msra.gmra.mrb[20].mxu0 %vm948_vm2, %v1363_v48 }
 0x478   : > { %2070 = vmatprep.mubr.msk.bf16.mxu0 %vm2569_vm0, %v2568_v0  ;;  %2067 = vmatpush3.bf16.msra.mxu0 %v2224_v25 }
 0x479   : > { %2068 = vmatprep.subr.bf16.mxu0 %v2568_v0 }
 0x47c   : > { %2069 = vmatpush3.bf16.msra.mxu0 %v2225_v27 }
 0x4c7   : > { %v1049_v49 = vpop.f32.mrb[8].mxu0 }
 0x4c8   : > { %v1055_v50 = vpack.c.bf16 %v1049_v49, %v1049_v49  ;;  %v2020_v51 = vpop.f32.mrb[9].mxu0 }
 0x4c9   : > { %v1052_v52 = vpop.f32.mrb[10].mxu0 }
 0x4ca   : > { %1057 = vst.msk [vmem:[#allocation2] sm:$0xf] %vm1056_vm4, %v1055_v50  ;;  %v2021_v53 = vpop.f32.mrb[11].mxu0 }
 0x539   : > { %v1166_v54 = vpop.f32.mrb[12].mxu0 }
 0x53a   : > { %v1947_v55 = vpack.c.bf16 %v1166_v54, %v1166_v54  ;;  %v2032_v56 = vpop.f32.mrb[13].mxu0 }
 0x53b   : > { %v1169_v57 = vpop.f32.mrb[14].mxu0 }
 0x53c   : > { %1176 = vrot.lane.b32.xlu1 %v1947_v55, %s2573_s27  ;;  %v2033_v58 = vpop.f32.mrb[15].mxu0 }
 0x542   : > { %v1286_v60 = vpop.f32.mrb[16].mxu0 }
 0x543   : > { %v1948_v62 = vpack.c.bf16 %v1286_v60, %v1286_v60  ;;  %v2044_v63 = vpop.f32.mrb[17].mxu0 }
 0x544   : > { %v1289_v1 = vpop.f32.mrb[18].mxu0 }
 0x545   : > { %1296 = vrot.lane.b32.xlu0 %v1948_v62, %s2574_s25  ;;  %v2045_v2 = vpop.f32.mrb[19].mxu0  ;;  %s3093_s25 = scalar_lea.hbm %s3216_s26, %s1944_s22 }
 0x546   : > { %v1941_v2 = vld [vmem:[%s3214_s3] ss:$0 sm:$0xff] }
 0x54a   : > { %v1406_v3 = vpop.f32.mrb[20].mxu0 }
 0x54b   : > { %v1949_v4 = vpack.c.bf16 %v1406_v3, %v1406_v3  ;;  %v2056_v5 = vpop.f32.mrb[21].mxu0 }
 0x54c   : > { %v1409_v6 = vpop.f32.mrb[22].mxu0 }
 0x54d   : > { %1416 = vrot.lane.b32.xlu1 %v1949_v4, %s2575_s21  ;;  %v2057_v7 = vpop.f32.mrb[23].mxu0  ;;  %s3212_s21 = sld [smem:[#allocation25_spill]]  ;;  %v1942_v4 = vld [vmem:[%s3215_s19] ss:$0 sm:$0xff] }
 0x553   : > { %s724_s29 = sand.u32 1, %s3212_s21  }
 0x554   : > { %s1898_s24 = sshll.u32 %s724_s29, 3  ;;  %s1703_s21 = scalar_lea.sflag [#allocation5], %s724_s29 }
 0x555   : > { %s726_s27 = scalar_lea.vmem [#allocation17], %s1898_s24  ;;  %s2478_s24 = sshll.u32 %s2576_s1, 4  ;;  %s2479_s24 = int_to_ptr.vmem [resolvable:$false] %s2478_s24 }
 0x556   : > { %s1716_s18 = sshll.u32 %s726_s27, 4  ;;  %s2480_s23 = scalar_lea.vmem %s2479_s24, 256  ;;  %s3095_s18 = int_to_ptr.vmem [resolvable:$true] %s1716_s18 }
 0x557   : > { %s2474_s20 = scalar_lea.vmem %s3095_s18, 128  ;;  %p2481_p0 = scmp.lt.s32.totalorder %s3095_s18, %s2479_s24 }
 0x558   : > { %p2475_p6 = scmp.ne.s32.totalorder %s3095_s18, %s2474_s20  ;;  %p2482_p2 = scmp.lt.s32.totalorder %s2480_s23, %s2474_s20 }
 0x55a   : > { %p2476_p5 = pnand %p2475_p6, %p3217_p9  ;;  %p2483_p3 = por %p2482_p2, %p2481_p0 }
 0x55c   : > { %p2477_p10 = pneg %p2476_p5 }
 0x55e   : > { %p2484_p4 = pnand %p2483_p3, %p2477_p10 }
 0x5ae   : > { %v1177_v8 = vpop.permute.xlu1 %1176 }
 0x5af   : > { %1180 = vst.msk [vmem:[#allocation2] sm:$0xf] %vm1179_vm5, %v1177_v8 }
 0x5b7   : > { %v1297_v9 = vpop.permute.xlu0 %1296 }
 0x5b8   : > { %1300 = vst.msk [vmem:[#allocation2] sm:$0xf] %vm1299_vm6, %v1297_v9 }
 0x5bf   : > { %v1417_v10 = vpop.permute.xlu1 %1416 }
 0x5c0   : > { %1420 = vst.msk [vmem:[#allocation2] sm:$0xf] %vm1419_vm7, %v1417_v10 }
 0x5c7   : > { %v1421_v11 = vld [vmem:[#allocation2] sm:$0xf] }
 0x5c8   : > { %2063 = vmatmul.mubr.msk.bf16.vlgmr.msra.gmra.mrb[20].mxu1 %vm766_vm1, %v1421_v11 }
 0x5c9   : > { %2082 = vmatprep.mubr.msk.bf16.mxu1 %vm2569_vm0, %v2568_v0 }
 0x69b   : > { %v1482_v13 = vpop.f32.mrb[20].mxu1 }
 0x69c   : > { %v1483_v14 = vadd.f32 %v1925_v12, %v1482_v13  ;;  %v2064_v15 = vpop.f32.mrb[21].mxu1 }
 0x69d   : > { %v1485_v16 = vpop.f32.mrb[22].mxu1 }
 0x69e   : > { %v2065_v17 = vpop.f32.mrb[23].mxu1  ;;  %v1488_v18 = vadd.f32 %v1483_v14, %v2982_v26  ;;  %v2226_v26 = vld [vmem:[%s3151_s15] sm:$0xff]  }
 0x69f   : > { %2075 = vmatpush3.bf16.msra.mxu1 %v2226_v26 }
 0x6a0   : > { %v1491_v19 = vsel %vm766_vm1, %v1488_v18, 0.0  ;;  %2076 = vmatprep.subr.bf16.mxu1 %v2568_v0 }
 0x6a1   : > { %1492 = vadd.xlane.f32.xlu0 %v1491_v19 }
 0x6a3   : > { %2077 = vmatpush3.bf16.msra.mxu1 %v2227_v28 }
 0x6a4   : > { %2078 = vmatprep.subr.bf16.mxu1 %v2568_v0 }
 0x6a7   : > { %2079 = vmatpush3.bf16.msra.mxu1 %v2228_v39 }
 0x6a8   : > { %2080 = vmatprep.subr.bf16.mxu1 %v2568_v0  ;;  %v1935_v0 = vld [vmem:[%s3152_s16] ss:$0 sm:$0xff] }
 0x6ab   : > { %2081 = vmatpush3.bf16.msra.mxu1 %v2229_v40 }
 0x72e   : > { %v1493_v20 = vpop.xlane.xlu0 %1492 }
 0x72f   : > { %v1495_v21 = vmul.f32 0.03125, %v1493_v20 }
 0x731   : > { %v1496_v22 = vsub.f32 %v1488_v18, %v1495_v21 }
 0x733   : > { %v1497_v23 = vmul.f32 %v1496_v22, %v1496_v22 }
 0x735   : > { %v1498_v24 = vsel %vm766_vm1, %v1497_v23, 0.0 }
 0x736   : > { %1499 = vadd.xlane.f32.xlu1 %v1498_v24 }
 0x7c3   : > { %v1500_v29 = vpop.xlane.xlu1 %1499 }
 0x7c4   : > { %v1501_v30 = vmul.f32 0.03125, %v1500_v29 }
 0x7c6   : > { %v1502_v31 = vadd.f32 1e-05, %v1501_v30 }
 0x7c8   : > { %2246 = vrsqrt.f32 %v1502_v31 }
 0x7d2   : > { %v2247_v32 = vpop.eup %2246 }
 0x7d3   : > { %v1504_v34 = vmul.f32 %v2247_v32, %v1496_v22 }
 0x7d5   : > { %v1511_v36 = vmul.f32 %v1929_v33, %v1504_v34 }
 0x7d7   : > { %v1518_v37 = vadd.f32 %v1930_v35, %v1511_v36 }
 0x7d9   : > { %v1519_v38 = vpack.c.bf16 %v1518_v37, %v1518_v37 }
 0x7db   : > { %2071 = vmatmul.mubr.msk.bf16.vlgmr.msra.gmra.mrb[24].mxu0 %vm766_vm1, %v1519_v38 }
 0x8ae   : > { %v1580_v42 = vpop.f32.mrb[24].mxu0 }
 0x8af   : > { %v1581_v43 = vadd.f32 %v1931_v41, %v1580_v42  ;;  %v2072_v44 = vpop.f32.mrb[25].mxu0 }
 0x8b0   : > { %v1583_v45 = vpop.f32.mrb[26].mxu0 }
 0x8b1   : > { %v1586_v46 = vmax.f32 %v1581_v43, 0.0  ;;  %v2073_v47 = vpop.f32.mrb[27].mxu0 }
 0x8b3   : > { %v1587_v48 = vpack.c.bf16 %v1586_v46, %v1586_v46 }
 0x8b5   : > { %2083 = vmatmul.mubr.msk.bf16.vlgmr.msra.gmra.mrb[24].mxu1 %vm1627_vm8, %v1587_v48 }
 0x988   : > { %v1665_v49 = vpop.f32.mrb[24].mxu1 }
 0x989   : > { %v1666_v50 = vadd.f32 %v1935_v0, %v1665_v49  ;;  %v2084_v51 = vpop.f32.mrb[25].mxu1 }
 0x98a   : > { %v1668_v52 = vpop.f32.mrb[26].mxu1 }
 0x98b   : > { %v2085_v53 = vpop.f32.mrb[27].mxu1  ;;  %v1671_v54 = vadd.f32 %v1666_v50, %v1518_v37 }
 0x98d   : > { %v1674_v55 = vsel %vm766_vm1, %v1671_v54, 0.0 }
 0x98e   : > { %1675 = vadd.xlane.f32.xlu0 %v1674_v55 }
 0xa1b   : > { %v1676_v56 = vpop.xlane.xlu0 %1675 }
 0xa1c   : > { %v1677_v57 = vmul.f32 0.03125, %v1676_v56 }
 0xa1e   : > { %v1678_v58 = vsub.f32 %v1671_v54, %v1677_v57 }
 0xa20   : > { %v1679_v59 = vmul.f32 %v1678_v58, %v1678_v58 }
 0xa22   : > { %v1680_v60 = vsel %vm766_vm1, %v1679_v59, 0.0 }
 0xa23   : > { %1681 = vadd.xlane.f32.xlu0 %v1680_v60 }
 0xab0   : > { %v1682_v61 = vpop.xlane.xlu0 %1681 }
 0xab1   : > { %v1683_v62 = vmul.f32 0.03125, %v1682_v61 }
 0xab3   : > { %v1684_v63 = vadd.f32 1e-05, %v1683_v62 }
 0xab5   : > { %2248 = vrsqrt.f32 %v1684_v63 }
 0xabf   : > { %v2249_v1 = vpop.eup %2248 }
 0xac0   : > { %v1686_v3 = vmul.f32 %v2249_v1, %v1678_v58 }
 0xac2   : > { %v1693_v5 = vmul.f32 %v1941_v2, %v1686_v3 }
 0xac4   : > { %v1700_v6 = vadd.f32 %v1942_v4, %v1693_v5 }
 0xac6   : > { %1701 = vst.msk [vmem:[%s726_s27] sm:$0xff] %vm766_vm1, %v1700_v6 }
 0xac7   : > { %2487 = shalt.err (!%p2484_p4)
}
 0xac8   : > { %s2488_s29 = scalar_lea.hbm %s3093_s25, 128  ;;  %s2492_s28 = scalar_lea.hbm %s3216_s26, 256 }
 0xac9   : > { %p2489_p12 = scmp.ne.s32.totalorder %s3093_s25, %s2488_s29  ;;  %p2493_p11 = scmp.lt.u32.totalorder %s3093_s25, %s3216_s26 }
 0xaca   : > { %p2494_p13 = scmp.lt.u32.totalorder %s2492_s28, %s2488_s29  ;;  %p2496_p6 = scmp.lt.u32.totalorder %s2488_s29, %s3093_s25 }
 0xacb   : > { %p2490_p7 = pnand %p2489_p12, %p3217_p9 }
 0xacc   : > { %p2495_p1 = por %p2494_p13, %p2493_p11 }
 0xacd   : > { %p2491_p8 = pneg %p2490_p7 }
 0xace   : > { %p2497_p5 = por %p2496_p6, %p2495_p1 }
 0xad0   : > { %p2498_p10 = pnand %p2497_p5, %p2491_p8 }
 0xad2   : > { %2501 = shalt.err (!%p2498_p10)
}
 0xad3   : > { %2118 = dma.vmem_to_hbm [thread:$0]  (%p3217_p9), %s3095_s18, 128, %s3093_s25, %s1703_s21  }
 0xad4 PF: > { %s3218_s27 = sld [smem:[#allocation27_spill]]  ;;  %s3219_s30 = sld [smem:[#allocation24_spill]] }
 0xad5   : > { %s3220_s5 = sld [smem:[#allocation31_spill]] }
 0xada   : > { %p2165_p0 = scmp.ge.s32.totalorder %s3218_s27, 2  ;;  %s1728_s20 = sand.u32 1, %s3219_s30  }
 0xadb   : > { %p3221_p2 = scmp.ne.s32.totalorder %s3220_s5, 0  ;;  %s1729_s1 = scalar_lea.sflag [#allocation5], %s1728_s20 }
 0xadd   : > { %p2146_p3 = pnand %p2165_p0, %p3221_p2 }
 0xadf   : > { %2539 = dma.done.wait (!%p2146_p3), %s1729_s1, 128  }
 0xae0   : > { %2541 = vsyncadd (!%p2146_p3), %s1729_s1, 4294967168  ;;  %s3222_s21 = sld [smem:[#allocation28_spill]]  ;;  %s3223_s0 = sld [smem:[#allocation25_spill]] }
 0xae1   : > { %s3224_s30 = sld [smem:[#allocation26_spill]]  ;;  %s3225_s20 = sld [smem:[#allocation29_spill]] }
 0xae6   : > { %p34_p4 = scmp.ge.s32.totalorder %s3222_s21, 4  }
 0xae8   :  { %36 = sbr.rel (!%p34_p4) target bundleno = 17 (0x11), region = 170 }
 0xaef   :  { %1734 = vsyncpa [#allocation4], 1 }
 0xaf0   :  { %1736 = vsyncpa [#allocation4 + $0x1], 1 }
 0xaf1   :  { %1737 = vsyncpa [#allocation7], 1 }
 0xaf2   :  { %1738 = vsyncpa [#allocation10], 1 }
 0xaf3   :  { %1739 = vsyncpa [#allocation13], 1 }
 0xaf4   :  { %1740 = vsyncpa [#allocation16], 1 }
 0xaf5   :  { %1741 = vsyncpa [#allocation5], 1 }
 0xaf6   :  { %1743 = vsyncpa [#allocation5 + $0x1], 1 }

</bundles_post_ra>
